<compile_context>
chip_gen: v6e
topology: v6e:2x2x1
jax: 0.10.0
libtpu: 0.0.40
codegen_flags: <defaults>
</compile_context>

<pallas_src>
import jax
import jax.numpy as jnp
from jax.experimental import pallas as pl
from jax.experimental.pallas import tpu as pltpu

NEG_SLOPE = 0.2
LANE = 128


def _round_up(n, m):
    return (n + m - 1) // m * m


def _leaky_relu(x):
    # max(x, 0.2*x) == LeakyReLU(0.2) for slope < 1 (mul+max vs cmp+mul+select).
    return jnp.maximum(x, NEG_SLOPE * x)


def encoder_kernel(x_ref, w1_ref, b1_ref, w2_ref, b2_ref,
                   wm_ref, bm_ref, wv_ref, bv_ref,
                   mean_ref, logvar_ref):
    # x tile arrives as f32 straight from the caller; cast once in VMEM for the
    # MXU (avoids a separate wrapper-side pad/cast pass over HBM).
    x = x_ref[...].astype(jnp.bfloat16)

    # FC_input + LeakyReLU  (bf16 MXU, f32 accumulate, f32 VPU epilogue, then a
    # single eager bf16 store so the next matmul's LHS lives once, narrow).
    h1 = _leaky_relu(
        jnp.dot(x, w1_ref[...], preferred_element_type=jnp.float32) + b1_ref[...]
    ).astype(jnp.bfloat16)

    # FC_input2 + LeakyReLU
    h2 = _leaky_relu(
        jnp.dot(h1, w2_ref[...], preferred_element_type=jnp.float32) + b2_ref[...]
    ).astype(jnp.bfloat16)

    # FC_mean / FC_var written directly to their own (tb, latent) outputs:
    # no padded slab in HBM and no wrapper-side slicing afterwards.
    mean_ref[...] = (
        jnp.dot(h2, wm_ref[...], preferred_element_type=jnp.float32) + bm_ref[...]
    ).astype(mean_ref.dtype)
    logvar_ref[...] = (
        jnp.dot(h2, wv_ref[...], preferred_element_type=jnp.float32) + bv_ref[...]
    ).astype(logvar_ref.dtype)


def prepare_params(params):
    """One-time prep (at init/load time, NOT per forward call):
    transpose to (in, out), zero-pad the hidden dim to a 128-lane multiple,
    cast weights to bf16, reshape biases to (1, out) f32.
    Zero padding is inert: pad lanes stay 0 through bias + LeakyReLU and the
    padded weight rows feeding the next layer are also 0."""
    hidden_dim, input_dim = params["w1"].shape
    latent_dim = params["wm"].shape[0]
    hid_pad = _round_up(hidden_dim, LANE)

    def padw(w_t, rows, cols):
        return jnp.pad(w_t, ((0, rows - w_t.shape[0]),
                             (0, cols - w_t.shape[1]))).astype(jnp.bfloat16)

    def padb(b, cols):
        return jnp.pad(b, (0, cols - b.shape[0])).reshape(1, cols).astype(jnp.float32)

    return dict(
        w1=padw(params["w1"].T, input_dim, hid_pad),
        b1=padb(params["b1"], hid_pad),
        w2=padw(params["w2"].T, hid_pad, hid_pad),
        b2=padb(params["b2"], hid_pad),
        wm=padw(params["wm"].T, hid_pad, latent_dim),
        bm=padb(params["bm"], latent_dim),
        wv=padw(params["wv"].T, hid_pad, latent_dim),
        bv=padb(params["bv"], latent_dim),
        input_dim=input_dim, hidden_dim=hidden_dim, latent_dim=latent_dim,
        hid_pad=hid_pad)


def encoder_forward(x, prepped, *, batch_tile=1024):
    """x: (B, input_dim) float32. prepped: output of prepare_params().
    Returns (mean, log_var), each (B, latent_dim) float32."""
    B = x.shape[0]
    input_dim = prepped["input_dim"]
    latent_dim = prepped["latent_dim"]
    hid_pad = prepped["hid_pad"]

    # Big tile to amortize per-grid-step overhead, but capped so there are
    # >= 2 grid steps when the batch allows (v7x: 2 TensorCores share the
    # "parallel" batch axis).  Multiple of 16 keeps the bf16 LHS packed.
    # No batch padding: Pallas handles the ragged last tile (OOB reads only
    # affect their own rows; OOB output writes are discarded).
    tb = min(batch_tile, max(16, _round_up(pl.cdiv(B, 2), 16)))
    grid = (pl.cdiv(B, tb),)

    def resident(shape):
        # Same block every grid step -> weights/biases stay VMEM-resident.
        return pl.BlockSpec(shape, lambda i: (0, 0))

    mean, log_var = pl.pallas_call(
        encoder_kernel,
        out_shape=(jax.ShapeDtypeStruct((B, latent_dim), jnp.float32),
                   jax.ShapeDtypeStruct((B, latent_dim), jnp.float32)),
        grid=grid,
        in_specs=[pl.BlockSpec((tb, input_dim), lambda i: (i, 0)),
                  resident((input_dim, hid_pad)), resident((1, hid_pad)),
                  resident((hid_pad, hid_pad)), resident((1, hid_pad)),
                  resident((hid_pad, latent_dim)), resident((1, latent_dim)),
                  resident((hid_pad, latent_dim)), resident((1, latent_dim))],
        out_specs=(pl.BlockSpec((tb, latent_dim), lambda i: (i, 0)),
                   pl.BlockSpec((tb, latent_dim), lambda i: (i, 0))),
        compiler_params=pltpu.CompilerParams(
            dimension_semantics=("parallel",),
            vmem_limit_bytes=32 * 1024 * 1024),
    )(x, prepped["w1"], prepped["b1"], prepped["w2"], prepped["b2"],
      prepped["wm"], prepped["bm"], prepped["wv"], prepped["bv"])
    return mean, log_var


def init_params(key, input_dim, hidden_dim, latent_dim):
    """Deterministic init mimicking PyTorch nn.Linear default (U[-1/sqrt(fan_in), +])."""
    def linear(k, fan_in, fan_out):
        kw, kb = jax.random.split(k)
        bound = 1.0 / jnp.sqrt(fan_in)
        w = jax.random.uniform(kw, (fan_out, fan_in), jnp.float32, -bound, bound)
        b = jax.random.uniform(kb, (fan_out,), jnp.float32, -bound, bound)
        return w, b

    k1, k2, k3, k4 = jax.random.split(key, 4)
    w1, b1 = linear(k1, input_dim, hidden_dim)
    w2, b2 = linear(k2, hidden_dim, hidden_dim)
    wm, bm = linear(k3, hidden_dim, latent_dim)
    wv, bv = linear(k4, hidden_dim, latent_dim)
    return dict(w1=w1, b1=b1, w2=w2, b2=b2, wm=wm, bm=bm, wv=wv, bv=bv)


def encoder_ref(x, params):
    """Pure-JAX f32 reference of the PyTorch forward for verification."""
    h1 = _leaky_relu(x @ params["w1"].T + params["b1"])
    h2 = _leaky_relu(h1 @ params["w2"].T + params["b2"])
    mean = h2 @ params["wm"].T + params["bm"]
    log_var = h2 @ params["wv"].T + params["bv"]
    return mean, log_var


if __name__ == "__main__":
    # Small shapes consistent with the module (hidden/latent from the script).
    batch = 8
    input_dim = 64
    hidden_dim = 400
    latent_dim = 200

    key = jax.random.PRNGKey(0)
    kx, kp = jax.random.split(key)
    x = jax.random.normal(kx, (batch, input_dim), jnp.float32)
    params = init_params(kp, input_dim, hidden_dim, latent_dim)

    prepped = prepare_params(params)          # one-time weight prep
    mean, log_var = encoder_forward(x, prepped)
    jax.block_until_ready((mean, log_var))

    mean_ref, log_var_ref = encoder_ref(x, params)
    assert mean.shape == (batch, latent_dim) and log_var.shape == (batch, latent_dim)
    # bf16 weights + bf16 inter-layer activations -> tolerance relaxed vs. pure f32.
    assert jnp.allclose(mean, mean_ref, atol=5e-2, rtol=5e-2)
    assert jnp.allclose(log_var, log_var_ref, atol=5e-2, rtol=5e-2)

    print("KERNEL_OK")
</pallas_src>

<mosaic_0001>
module attributes {stable_mosaic.version = 11 : i64} {
  func.func @encoder_kernel(%arg0: i32, %arg1: memref<16x64xf32, #tpu.memory_space<vmem>>, %arg2: memref<64x512xbf16, #tpu.memory_space<vmem>>, %arg3: memref<1x512xf32, #tpu.memory_space<vmem>>, %arg4: memref<512x512xbf16, #tpu.memory_space<vmem>>, %arg5: memref<1x512xf32, #tpu.memory_space<vmem>>, %arg6: memref<512x200xbf16, #tpu.memory_space<vmem>>, %arg7: memref<1x200xf32, #tpu.memory_space<vmem>>, %arg8: memref<512x200xbf16, #tpu.memory_space<vmem>>, %arg9: memref<1x200xf32, #tpu.memory_space<vmem>>, %arg10: memref<16x200xf32, #tpu.memory_space<vmem>>, %arg11: memref<16x200xf32, #tpu.memory_space<vmem>>) attributes {dimension_semantics = [#tpu.dimension_semantics<parallel>], iteration_bounds = array<i64: 1>, scalar_prefetch = 0 : i64, scratch_operands = 0 : i64, tpu.core_type = #tpu.core_type<tc>, window_params = [{transform_indices = @transform_0, window_bounds = array<i64: 16, 64>}, {pipeline_mode = #tpu.pipeline_mode<synchronous>, transform_indices = @transform_1, window_bounds = array<i64: 64, 512>}, {pipeline_mode = #tpu.pipeline_mode<synchronous>, transform_indices = @transform_2, window_bounds = array<i64: 1, 512>}, {pipeline_mode = #tpu.pipeline_mode<synchronous>, transform_indices = @transform_3, window_bounds = array<i64: 512, 512>}, {pipeline_mode = #tpu.pipeline_mode<synchronous>, transform_indices = @transform_4, window_bounds = array<i64: 1, 512>}, {pipeline_mode = #tpu.pipeline_mode<synchronous>, transform_indices = @transform_5, window_bounds = array<i64: 512, 200>}, {pipeline_mode = #tpu.pipeline_mode<synchronous>, transform_indices = @transform_6, window_bounds = array<i64: 1, 200>}, {pipeline_mode = #tpu.pipeline_mode<synchronous>, transform_indices = @transform_7, window_bounds = array<i64: 512, 200>}, {pipeline_mode = #tpu.pipeline_mode<synchronous>, transform_indices = @transform_8, window_bounds = array<i64: 1, 200>}, {transform_indices = @transform_9, window_bounds = array<i64: 16, 200>}, {transform_indices = @transform_10, window_bounds = array<i64: 16, 200>}]} {
    %c0 = arith.constant 0 : index
    %c0_0 = arith.constant 0 : index
    %0 = vector.load %arg1[%c0, %c0_0] : memref<16x64xf32, #tpu.memory_space<vmem>>, vector<16x64xf32>
    %1 = arith.truncf %0 : vector<16x64xf32> to vector<16x64xbf16>
    %c0_1 = arith.constant 0 : index
    %c0_2 = arith.constant 0 : index
    %2 = vector.load %arg2[%c0_1, %c0_2] : memref<64x512xbf16, #tpu.memory_space<vmem>>, vector<64x512xbf16>
    %cst = arith.constant dense<0.000000e+00> : vector<16x512xf32>
    %3 = tpu.matmul %1, %2, %cst {dimension_numbers = #tpu.dot_dimension_numbers<[1], [0], [0], [1], [0, 0, 1, 1], [], []>} : vector<16x64xbf16>, vector<64x512xbf16>, vector<16x512xf32> -> vector<16x512xf32>
    %c0_3 = arith.constant 0 : index
    %c0_4 = arith.constant 0 : index
    %4 = vector.load %arg3[%c0_3, %c0_4] : memref<1x512xf32, #tpu.memory_space<vmem>>, vector<1x512xf32>
    %5 = vector.broadcast %4 : vector<1x512xf32> to vector<16x512xf32>
    %6 = arith.addf %3, %5 : vector<16x512xf32>
    %cst_5 = arith.constant 2.000000e-01 : f32
    %7 = vector.broadcast %cst_5 : f32 to vector<16x512xf32>
    %8 = arith.mulf %7, %6 : vector<16x512xf32>
    %9 = arith.maximumf %6, %8 : vector<16x512xf32>
    %10 = arith.truncf %9 : vector<16x512xf32> to vector<16x512xbf16>
    %c0_6 = arith.constant 0 : index
    %c0_7 = arith.constant 0 : index
    %11 = vector.load %arg4[%c0_6, %c0_7] : memref<512x512xbf16, #tpu.memory_space<vmem>>, vector<512x512xbf16>
    %cst_8 = arith.constant dense<0.000000e+00> : vector<16x512xf32>
    %12 = tpu.matmul %10, %11, %cst_8 {dimension_numbers = #tpu.dot_dimension_numbers<[1], [0], [0], [1], [0, 0, 1, 1], [], []>} : vector<16x512xbf16>, vector<512x512xbf16>, vector<16x512xf32> -> vector<16x512xf32>
    %c0_9 = arith.constant 0 : index
    %c0_10 = arith.constant 0 : index
    %13 = vector.load %arg5[%c0_9, %c0_10] : memref<1x512xf32, #tpu.memory_space<vmem>>, vector<1x512xf32>
    %14 = vector.broadcast %13 : vector<1x512xf32> to vector<16x512xf32>
    %15 = arith.addf %12, %14 : vector<16x512xf32>
    %cst_11 = arith.constant 2.000000e-01 : f32
    %16 = vector.broadcast %cst_11 : f32 to vector<16x512xf32>
    %17 = arith.mulf %16, %15 : vector<16x512xf32>
    %18 = arith.maximumf %15, %17 : vector<16x512xf32>
    %19 = arith.truncf %18 : vector<16x512xf32> to vector<16x512xbf16>
    %c0_12 = arith.constant 0 : index
    %c0_13 = arith.constant 0 : index
    %20 = vector.load %arg6[%c0_12, %c0_13] : memref<512x200xbf16, #tpu.memory_space<vmem>>, vector<512x200xbf16>
    %cst_14 = arith.constant dense<0.000000e+00> : vector<16x200xf32>
    %21 = tpu.matmul %19, %20, %cst_14 {dimension_numbers = #tpu.dot_dimension_numbers<[1], [0], [0], [1], [0, 0, 1, 1], [], []>} : vector<16x512xbf16>, vector<512x200xbf16>, vector<16x200xf32> -> vector<16x200xf32>
    %c0_15 = arith.constant 0 : index
    %c0_16 = arith.constant 0 : index
    %22 = vector.load %arg7[%c0_15, %c0_16] : memref<1x200xf32, #tpu.memory_space<vmem>>, vector<1x200xf32>
    %23 = vector.broadcast %22 : vector<1x200xf32> to vector<16x200xf32>
    %24 = arith.addf %21, %23 : vector<16x200xf32>
    %c0_17 = arith.constant 0 : index
    %c0_18 = arith.constant 0 : index
    %25 = vector.load %arg10[%c0_17, %c0_18] : memref<16x200xf32, #tpu.memory_space<vmem>>, vector<16x200xf32>
    tpu.vector_store %arg10[%c0_17, %c0_18], %24 {strides = array<i32>} : memref<16x200xf32, #tpu.memory_space<vmem>>, vector<16x200xf32>,
    %c0_19 = arith.constant 0 : index
    %c0_20 = arith.constant 0 : index
    %26 = vector.load %arg8[%c0_19, %c0_20] : memref<512x200xbf16, #tpu.memory_space<vmem>>, vector<512x200xbf16>
    %cst_21 = arith.constant dense<0.000000e+00> : vector<16x200xf32>
    %27 = tpu.matmul %19, %26, %cst_21 {dimension_numbers = #tpu.dot_dimension_numbers<[1], [0], [0], [1], [0, 0, 1, 1], [], []>} : vector<16x512xbf16>, vector<512x200xbf16>, vector<16x200xf32> -> vector<16x200xf32>
    %c0_22 = arith.constant 0 : index
    %c0_23 = arith.constant 0 : index
    %28 = vector.load %arg9[%c0_22, %c0_23] : memref<1x200xf32, #tpu.memory_space<vmem>>, vector<1x200xf32>
    %29 = vector.broadcast %28 : vector<1x200xf32> to vector<16x200xf32>
    %30 = arith.addf %27, %29 : vector<16x200xf32>
    %c0_24 = arith.constant 0 : index
    %c0_25 = arith.constant 0 : index
    %31 = vector.load %arg11[%c0_24, %c0_25] : memref<16x200xf32, #tpu.memory_space<vmem>>, vector<16x200xf32>
    tpu.vector_store %arg11[%c0_24, %c0_25], %30 {strides = array<i32>} : memref<16x200xf32, #tpu.memory_space<vmem>>, vector<16x200xf32>,
    return
  }
  func.func @transform_0(%arg0: i32) -> (i32, i32) {
    %c0_i32 = arith.constant 0 : i32
    %c0_i32_0 = arith.constant 0 : i32
    return %arg0, %c0_i32 : i32, i32
  }
  func.func @transform_1(%arg0: i32) -> (i32, i32) {
    %c0_i32 = arith.constant 0 : i32
    %c0_i32_0 = arith.constant 0 : i32
    %c0_i32_1 = arith.constant 0 : i32
    return %c0_i32, %c0_i32_0 : i32, i32
  }
  func.func @transform_2(%arg0: i32) -> (i32, i32) {
    %c0_i32 = arith.constant 0 : i32
    %c0_i32_0 = arith.constant 0 : i32
    %c0_i32_1 = arith.constant 0 : i32
    return %c0_i32, %c0_i32_0 : i32, i32
  }
  func.func @transform_3(%arg0: i32) -> (i32, i32) {
    %c0_i32 = arith.constant 0 : i32
    %c0_i32_0 = arith.constant 0 : i32
    %c0_i32_1 = arith.constant 0 : i32
    return %c0_i32, %c0_i32_0 : i32, i32
  }
  func.func @transform_4(%arg0: i32) -> (i32, i32) {
    %c0_i32 = arith.constant 0 : i32
    %c0_i32_0 = arith.constant 0 : i32
    %c0_i32_1 = arith.constant 0 : i32
    return %c0_i32, %c0_i32_0 : i32, i32
  }
  func.func @transform_5(%arg0: i32) -> (i32, i32) {
    %c0_i32 = arith.constant 0 : i32
    %c0_i32_0 = arith.constant 0 : i32
    %c0_i32_1 = arith.constant 0 : i32
    return %c0_i32, %c0_i32_0 : i32, i32
  }
  func.func @transform_6(%arg0: i32) -> (i32, i32) {
    %c0_i32 = arith.constant 0 : i32
    %c0_i32_0 = arith.constant 0 : i32
    %c0_i32_1 = arith.constant 0 : i32
    return %c0_i32, %c0_i32_0 : i32, i32
  }
  func.func @transform_7(%arg0: i32) -> (i32, i32) {
    %c0_i32 = arith.constant 0 : i32
    %c0_i32_0 = arith.constant 0 : i32
    %c0_i32_1 = arith.constant 0 : i32
    return %c0_i32, %c0_i32_0 : i32, i32
  }
  func.func @transform_8(%arg0: i32) -> (i32, i32) {
    %c0_i32 = arith.constant 0 : i32
    %c0_i32_0 = arith.constant 0 : i32
    %c0_i32_1 = arith.constant 0 : i32
    return %c0_i32, %c0_i32_0 : i32, i32
  }
  func.func @transform_9(%arg0: i32) -> (i32, i32) {
    %c0_i32 = arith.constant 0 : i32
    %c0_i32_0 = arith.constant 0 : i32
    return %arg0, %c0_i32 : i32, i32
  }
  func.func @transform_10(%arg0: i32) -> (i32, i32) {
    %c0_i32 = arith.constant 0 : i32
    %c0_i32_0 = arith.constant 0 : i32
    return %arg0, %c0_i32 : i32, i32
  }
}

</mosaic_0001>

<bundles_post_ra>
// kernel: tpu_custom_call.1
= control target key start
LH: loop header
LB: loop body
LE: loop exit
PB: predicated region body
PF: predicated region fallthrough
CT: control target
= control target key end

     0   :  { %16 = vsyncpa [#allocation3], 0  ;;  %s3938_s0 = inlined_call_operand.vmem [shape: f32[8,64], index: 0, kind: input, shape index: {}]   ;;  %s3939_s1 = inlined_call_operand.vmem [shape: bf16[64,512], index: 1, kind: input, shape index: {}]   ;;  %s3940_s2 = inlined_call_operand.vmem [shape: f32[1,512], index: 2, kind: input, shape index: {}]   ;;  %s3941_s3 = inlined_call_operand.vmem [shape: bf16[512,512], index: 3, kind: input, shape index: {}]   ;;  %s3942_s4 = inlined_call_operand.vmem [shape: f32[1,512], index: 4, kind: input, shape index: {}]   ;;  %s3943_s5 = inlined_call_operand.vmem [shape: bf16[512,200], index: 5, kind: input, shape index: {}]   ;;  %s3944_s6 = inlined_call_operand.vmem [shape: f32[1,200], index: 6, kind: input, shape index: {}]   ;;  %s3945_s7 = inlined_call_operand.vmem [shape: bf16[512,200], index: 7, kind: input, shape index: {}]   ;;  %s3946_s8 = inlined_call_operand.vmem [shape: f32[1,200], index: 8, kind: input, shape index: {}]   ;;  %s3947_s9 = inlined_call_operand.hbm [shape: f32[8,200], index: 9, kind: output, shape index: {0}]   ;;  %s3948_s10 = inlined_call_operand.hbm [shape: f32[8,200], index: 10, kind: output, shape index: {1}]  }
   0x1   :  { %17 = vsyncpa [#allocation5], 0  ;;  %v2534_v0 = vld [vmem:[%s3939_s1 + $0x64] ss:$16 sps:$4 sm:$0xff]   ;;  %v2986_v1 = vmov 0   ;;  %v38_v18 = vld [vmem:[%s3938_s0 + $0x8] sm:$0xff] }
   0x2   :  { %194 = vmatprep.mubr.bf16.mxu0 %v2986_v1  ;;  %237 = vmatprep.mubr.bf16.mxu1 %v2986_v1  ;;  %v2536_v2 = vld [vmem:[%s3939_s1 + $0x6c] ss:$16 sps:$4 sm:$0xff]   ;;  %v2538_v3 = vld [vmem:[%s3939_s1 + $0x60] ss:$16 sps:$4 sm:$0xff]   ;;  %v2539_v4 = vld [vmem:[%s3939_s1 + $0x68] ss:$16 sps:$4 sm:$0xff]  }
   0x3   :  { %170 = vmatprep.subr.bf16.mxu0 %v2534_v0  ;;  %v2540_v5 = vld [vmem:[%s3939_s1 + $0x44] ss:$16 sps:$4 sm:$0xff]   ;;  %213 = vmatprep.subr.bf16.mxu1 %v2536_v2  ;;  %v2542_v6 = vld [vmem:[%s3939_s1 + $0x4c] ss:$16 sps:$4 sm:$0xff]   ;;  %v2544_v7 = vld [vmem:[%s3939_s1 + $0x40] ss:$16 sps:$4 sm:$0xff]  }
   0x4   :  { %171 = vmatpush1.bf16.msra.mxu0 %v2538_v3  ;;  %214 = vmatpush1.bf16.msra.mxu1 %v2539_v4  ;;  %v2545_v8 = vld [vmem:[%s3939_s1 + $0x48] ss:$16 sps:$4 sm:$0xff]   ;;  %v2546_v9 = vld [vmem:[%s3939_s1 + $0x24] ss:$16 sps:$4 sm:$0xff]   ;;  %v2548_v10 = vld [vmem:[%s3939_s1 + $0x2c] ss:$16 sps:$4 sm:$0xff]  }
   0x5   :  { %172 = vmatprep.subr.bf16.mxu0 %v2540_v5  ;;  %215 = vmatprep.subr.bf16.mxu1 %v2542_v6  ;;  %v2550_v11 = vld [vmem:[%s3939_s1 + $0x20] ss:$16 sps:$4 sm:$0xff]   ;;  %v2551_v12 = vld [vmem:[%s3939_s1 + $0x28] ss:$16 sps:$4 sm:$0xff]   ;;  %v2552_v13 = vld [vmem:[%s3939_s1 + $0x4] ss:$16 sps:$4 sm:$0xff]  }
   0x6   :  { %v2554_v14 = vld [vmem:[%s3939_s1 + $0xc] ss:$16 sps:$4 sm:$0xff]   ;;  %v2556_v15 = vld [vmem:[%s3939_s1] ss:$16 sps:$4 sm:$0xff]   ;;  %v2557_v16 = vld [vmem:[%s3939_s1 + $0x8] ss:$16 sps:$4 sm:$0xff]  }
   0x7   :  { %v37_v17 = vld [vmem:[%s3938_s0] sm:$0xff]  ;;  %vm158_vm0 = vcmask 523264   ;;  %vm1733_vm1 = vcmask 588800  }
   0x8   :  { %173 = vmatpush1.bf16.msra.mxu0 %v2544_v7  ;;  %216 = vmatpush1.bf16.msra.mxu1 %v2545_v8  ;;  %v2560_v19 = vld [vmem:[%s3941_s3 + $0xe4] ss:$16 sps:$4 sm:$0xff]   ;;  %v39_v21 = vpack.c.bf16 %v38_v18, %v37_v17  ;;  %v2558_v22 = vld [vmem:[%s3941_s3 + $0xe0] ss:$16 sps:$4 sm:$0xff]  }
   0x9   :  { %174 = vmatprep.subr.bf16.mxu0 %v2546_v9  ;;  %217 = vmatprep.subr.bf16.mxu1 %v2548_v10  ;;  %v2563_v20 = vld [vmem:[%s3941_s3 + $0x2e4] ss:$16 sps:$4 sm:$0xff]   ;;  %v2561_v23 = vld [vmem:[%s3941_s3 + $0x2e0] ss:$16 sps:$4 sm:$0xff]  }
   0xa   :  { %v2566_v24 = vld [vmem:[%s3941_s3 + $0xc4] ss:$16 sps:$4 sm:$0xff]   ;;  %v2564_v26 = vld [vmem:[%s3941_s3 + $0xc0] ss:$16 sps:$4 sm:$0xff]  }
   0xb   :  { %v2569_v25 = vld [vmem:[%s3941_s3 + $0x2c4] ss:$16 sps:$4 sm:$0xff]   ;;  %v2567_v27 = vld [vmem:[%s3941_s3 + $0x2c0] ss:$16 sps:$4 sm:$0xff]  }
   0xc   :  { %175 = vmatpush1.bf16.msra.mxu0 %v2550_v11  ;;  %218 = vmatpush1.bf16.msra.mxu1 %v2551_v12  ;;  %v2572_v28 = vld [vmem:[%s3941_s3 + $0xa4] ss:$16 sps:$4 sm:$0xff]   ;;  %v2570_v30 = vld [vmem:[%s3941_s3 + $0xa0] ss:$16 sps:$4 sm:$0xff]  }
   0xd   :  { %176 = vmatprep.subr.bf16.mxu0 %v2552_v13  ;;  %219 = vmatprep.subr.bf16.mxu1 %v2554_v14  ;;  %v2575_v29 = vld [vmem:[%s3941_s3 + $0x2a4] ss:$16 sps:$4 sm:$0xff]   ;;  %v2573_v31 = vld [vmem:[%s3941_s3 + $0x2a0] ss:$16 sps:$4 sm:$0xff]  }
   0xe   :  { %v2578_v32 = vld [vmem:[%s3941_s3 + $0x84] ss:$16 sps:$4 sm:$0xff]   ;;  %v2576_v34 = vld [vmem:[%s3941_s3 + $0x80] ss:$16 sps:$4 sm:$0xff]  }
   0xf   :  { %v2581_v33 = vld [vmem:[%s3941_s3 + $0x284] ss:$16 sps:$4 sm:$0xff]   ;;  %v2579_v35 = vld [vmem:[%s3941_s3 + $0x280] ss:$16 sps:$4 sm:$0xff]  }
  0x10   :  { %177 = vmatpush1.bf16.msra.mxu0 %v2556_v15  ;;  %220 = vmatpush1.bf16.msra.mxu1 %v2557_v16  ;;  %v2584_v36 = vld [vmem:[%s3941_s3 + $0x64] ss:$16 sps:$4 sm:$0xff]   ;;  %v2582_v38 = vld [vmem:[%s3941_s3 + $0x60] ss:$16 sps:$4 sm:$0xff]  }
  0x11   :  { %1058 = vmatprep.subr.bf16.mxu0 %v2560_v19  ;;  %1101 = vmatprep.subr.bf16.mxu1 %v2563_v20  ;;  %v2587_v37 = vld [vmem:[%s3941_s3 + $0x264] ss:$16 sps:$4 sm:$0xff]   ;;  %v2585_v39 = vld [vmem:[%s3941_s3 + $0x260] ss:$16 sps:$4 sm:$0xff]   ;;  %v2656_v20 = vld [vmem:[%s3941_s3 + $0xec] ss:$16 sps:$4 sm:$0xff]  }
  0x12   :  { %v2590_v40 = vld [vmem:[%s3941_s3 + $0x44] ss:$16 sps:$4 sm:$0xff]   ;;  %v2588_v42 = vld [vmem:[%s3941_s3 + $0x40] ss:$16 sps:$4 sm:$0xff]  }
  0x13   :  { %2271 = vmatmul.mubr.msk.bf16.vlgmr.msra.gmra.mxu0 %vm158_vm0, %v39_v21  ;;  %2272 = vmatmul.mubr.msk.bf16.vlgmr.msra.gmra.mxu1 %vm158_vm0, %v39_v21  ;;  %v2593_v41 = vld [vmem:[%s3941_s3 + $0x244] ss:$16 sps:$4 sm:$0xff]   ;;  %v2591_v43 = vld [vmem:[%s3941_s3 + $0x240] ss:$16 sps:$4 sm:$0xff]   ;;  %v2659_v21 = vld [vmem:[%s3941_s3 + $0x2ec] ss:$16 sps:$4 sm:$0xff]  }
  0x14   :  { %1059 = vmatpush1.bf16.msra.mxu0 %v2558_v22  ;;  %1102 = vmatpush1.bf16.msra.mxu1 %v2561_v23  ;;  %v2596_v44 = vld [vmem:[%s3941_s3 + $0x24] ss:$16 sps:$4 sm:$0xff]   ;;  %v2594_v46 = vld [vmem:[%s3941_s3 + $0x20] ss:$16 sps:$4 sm:$0xff]   ;;  %v58_v22 = vlaneseq }
  0x15   :  { %1060 = vmatprep.subr.bf16.mxu0 %v2566_v24  ;;  %1103 = vmatprep.subr.bf16.mxu1 %v2569_v25  ;;  %v2599_v45 = vld [vmem:[%s3941_s3 + $0x224] ss:$16 sps:$4 sm:$0xff]   ;;  %v2597_v47 = vld [vmem:[%s3941_s3 + $0x220] ss:$16 sps:$4 sm:$0xff]  }
  0x16   :  { %v2602_v48 = vld [vmem:[%s3941_s3 + $0x4] ss:$16 sps:$4 sm:$0xff]   ;;  %v2600_v50 = vld [vmem:[%s3941_s3] ss:$16 sps:$4 sm:$0xff]   ;;  %v3298_v23 = vshrl.u32 %v58_v22, 7 }
  0x17   :  { %v2605_v49 = vld [vmem:[%s3941_s3 + $0x204] ss:$16 sps:$4 sm:$0xff]   ;;  %v2603_v51 = vld [vmem:[%s3941_s3 + $0x200] ss:$16 sps:$4 sm:$0xff]   ;;  %v2681_v22 = vld [vmem:[%s3941_s3 + $0x268] ss:$16 sps:$4 sm:$0xff]  }
  0x18   :  { %1061 = vmatpush1.bf16.msra.mxu0 %v2564_v26  ;;  %1104 = vmatpush1.bf16.msra.mxu1 %v2567_v27  ;;  %v2608_v52 = vld [vmem:[%s3941_s3 + $0x1e4] ss:$16 sps:$4 sm:$0xff]   ;;  %v2606_v53 = vld [vmem:[%s3941_s3 + $0x1e0] ss:$16 sps:$4 sm:$0xff]   ;;  %v3301_v24 = vsub.s32 1, %v3298_v23  ;;  %v3304_v25 = vsub.s32 0, %v3298_v23 }
  0x19   :  { %1062 = vmatprep.subr.bf16.mxu0 %v2572_v28  ;;  %1105 = vmatprep.subr.bf16.mxu1 %v2575_v29  ;;  %v2611_v54 = vld [vmem:[%s3941_s3 + $0x3e4] ss:$16 sps:$4 sm:$0xff]   ;;  %v2609_v55 = vld [vmem:[%s3941_s3 + $0x3e0] ss:$16 sps:$4 sm:$0xff]   ;;  %v72_v26 = vsub.s32 3, %v3298_v23  ;;  %v68_v28 = vsub.s32 2, %v3298_v23 }
  0x1a   :  { %v2614_v56 = vld [vmem:[%s3941_s3 + $0x1c4] ss:$16 sps:$4 sm:$0xff]   ;;  %v2612_v58 = vld [vmem:[%s3941_s3 + $0x1c0] ss:$16 sps:$4 sm:$0xff]  }
  0x1b   :  { %v2617_v57 = vld [vmem:[%s3941_s3 + $0x3c4] ss:$16 sps:$4 sm:$0xff]   ;;  %v2615_v59 = vld [vmem:[%s3941_s3 + $0x3c0] ss:$16 sps:$4 sm:$0xff]  }
  0x1c   :  { %1063 = vmatpush1.bf16.msra.mxu0 %v2570_v30  ;;  %1106 = vmatpush1.bf16.msra.mxu1 %v2573_v31  ;;  %v2620_v60 = vld [vmem:[%s3941_s3 + $0x1a4] ss:$16 sps:$4 sm:$0xff]   ;;  %v2618_v62 = vld [vmem:[%s3941_s3 + $0x1a0] ss:$16 sps:$4 sm:$0xff]  }
  0x1d   :  { %1064 = vmatprep.subr.bf16.mxu0 %v2578_v32  ;;  %1107 = vmatprep.subr.bf16.mxu1 %v2581_v33  ;;  %v2623_v61 = vld [vmem:[%s3941_s3 + $0x3a4] ss:$16 sps:$4 sm:$0xff]   ;;  %v2621_v63 = vld [vmem:[%s3941_s3 + $0x3a0] ss:$16 sps:$4 sm:$0xff]  }
  0x1e   :  { %v2626_v0 = vld [vmem:[%s3941_s3 + $0x184] ss:$16 sps:$4 sm:$0xff]   ;;  %v2624_v2 = vld [vmem:[%s3941_s3 + $0x180] ss:$16 sps:$4 sm:$0xff]  }
  0x1f   :  { %v2629_v1 = vld [vmem:[%s3941_s3 + $0x384] ss:$16 sps:$4 sm:$0xff]   ;;  %v2627_v3 = vld [vmem:[%s3941_s3 + $0x380] ss:$16 sps:$4 sm:$0xff]  }
  0x20   :  { %1065 = vmatpush1.bf16.msra.mxu0 %v2576_v34  ;;  %1108 = vmatpush1.bf16.msra.mxu1 %v2579_v35  ;;  %v2632_v4 = vld [vmem:[%s3941_s3 + $0x164] ss:$16 sps:$4 sm:$0xff]   ;;  %v2630_v6 = vld [vmem:[%s3941_s3 + $0x160] ss:$16 sps:$4 sm:$0xff]  }
  0x21   :  { %1066 = vmatprep.subr.bf16.mxu0 %v2584_v36  ;;  %1109 = vmatprep.subr.bf16.mxu1 %v2587_v37  ;;  %v2635_v5 = vld [vmem:[%s3941_s3 + $0x364] ss:$16 sps:$4 sm:$0xff]   ;;  %v2633_v7 = vld [vmem:[%s3941_s3 + $0x360] ss:$16 sps:$4 sm:$0xff]  }
  0x22   :  { %v2638_v8 = vld [vmem:[%s3941_s3 + $0x144] ss:$16 sps:$4 sm:$0xff]   ;;  %v2636_v10 = vld [vmem:[%s3941_s3 + $0x140] ss:$16 sps:$4 sm:$0xff]  }
  0x23   :  { %v2641_v9 = vld [vmem:[%s3941_s3 + $0x344] ss:$16 sps:$4 sm:$0xff]   ;;  %v2639_v11 = vld [vmem:[%s3941_s3 + $0x340] ss:$16 sps:$4 sm:$0xff]  }
  0x24   :  { %1067 = vmatpush1.bf16.msra.mxu0 %v2582_v38  ;;  %1110 = vmatpush1.bf16.msra.mxu1 %v2585_v39  ;;  %v2644_v12 = vld [vmem:[%s3941_s3 + $0x124] ss:$16 sps:$4 sm:$0xff]   ;;  %v2642_v14 = vld [vmem:[%s3941_s3 + $0x120] ss:$16 sps:$4 sm:$0xff]  }
  0x25   :  { %1068 = vmatprep.subr.bf16.mxu0 %v2590_v40  ;;  %1111 = vmatprep.subr.bf16.mxu1 %v2593_v41  ;;  %v2647_v13 = vld [vmem:[%s3941_s3 + $0x324] ss:$16 sps:$4 sm:$0xff]   ;;  %v2645_v15 = vld [vmem:[%s3941_s3 + $0x320] ss:$16 sps:$4 sm:$0xff]  }
  0x26   :  { %v2650_v16 = vld [vmem:[%s3941_s3 + $0x104] ss:$16 sps:$4 sm:$0xff]   ;;  %v2648_v18 = vld [vmem:[%s3941_s3 + $0x100] ss:$16 sps:$4 sm:$0xff]  }
  0x27   :  { %v2653_v17 = vld [vmem:[%s3941_s3 + $0x304] ss:$16 sps:$4 sm:$0xff]   ;;  %v2651_v19 = vld [vmem:[%s3941_s3 + $0x300] ss:$16 sps:$4 sm:$0xff]  }
  0x28   :  { %1069 = vmatpush1.bf16.msra.mxu0 %v2588_v42  ;;  %1112 = vmatpush1.bf16.msra.mxu1 %v2591_v43  ;;  %v56_v27 = vld [vmem:[%s3940_s2] sm:$0xf] }
  0x29   :  { %1070 = vmatprep.subr.bf16.mxu0 %v2596_v44  ;;  %1113 = vmatprep.subr.bf16.mxu1 %v2599_v45  ;;  %v65_v29 = vrot.slane %v56_v27, %v3301_v24  ;;  %v61_v30 = vrot.slane %v56_v27, %v3304_v25  ;;  %v73_v32 = vrot.slane %v56_v27, %v72_v26  ;;  %v2879_v23 = vld [vmem:[%s3945_s7 + $0xa0] ss:$8 sps:$4 sm:$0xff]  }
  0x2a   :  { %v69_v33 = vrot.slane %v56_v27, %v68_v28  ;;  %v2686_v27 = vld [vmem:[%s3941_s3 + $0x4c] ss:$16 sps:$4 sm:$0xff]  }
  0x2c   :  { %1071 = vmatpush1.bf16.msra.mxu0 %v2594_v46  ;;  %1114 = vmatpush1.bf16.msra.mxu1 %v2597_v47 }
  0x2d   :  { %1072 = vmatprep.subr.bf16.mxu0 %v2602_v48  ;;  %1115 = vmatprep.subr.bf16.mxu1 %v2605_v49 }
  0x30   :  { %1073 = vmatpush1.bf16.msra.mxu0 %v2600_v50  ;;  %1116 = vmatpush1.bf16.msra.mxu1 %v2603_v51 }
  0x31   :  { %1074 = vmatprep.subr.bf16.mxu0 %v2608_v52  ;;  %1117 = vmatprep.subr.bf16.mxu1 %v2611_v54 }
  0x34   :  { %1075 = vmatpush2.bf16.msra.mxu0 %v2606_v53  ;;  %1118 = vmatpush2.bf16.msra.mxu1 %v2609_v55 }
  0x35   :  { %1076 = vmatprep.subr.bf16.mxu0 %v2614_v56  ;;  %1119 = vmatprep.subr.bf16.mxu1 %v2617_v57 }
  0x38   :  { %1077 = vmatpush2.bf16.msra.mxu0 %v2612_v58  ;;  %1120 = vmatpush2.bf16.msra.mxu1 %v2615_v59 }
  0x39   :  { %1078 = vmatprep.subr.bf16.mxu0 %v2620_v60  ;;  %1121 = vmatprep.subr.bf16.mxu1 %v2623_v61 }
  0x3c   :  { %1079 = vmatpush2.bf16.msra.mxu0 %v2618_v62  ;;  %1122 = vmatpush2.bf16.msra.mxu1 %v2621_v63 }
  0x3d   :  { %1080 = vmatprep.subr.bf16.mxu0 %v2626_v0  ;;  %1123 = vmatprep.subr.bf16.mxu1 %v2629_v1 }
  0x40   :  { %1081 = vmatpush2.bf16.msra.mxu0 %v2624_v2  ;;  %1124 = vmatpush2.bf16.msra.mxu1 %v2627_v3  ;;  %v2654_v2 = vld [vmem:[%s3941_s3 + $0xe8] ss:$16 sps:$4 sm:$0xff]  }
  0x41   :  { %1082 = vmatprep.subr.bf16.mxu0 %v2632_v4  ;;  %1125 = vmatprep.subr.bf16.mxu1 %v2635_v5  ;;  %v2657_v5 = vld [vmem:[%s3941_s3 + $0x2e8] ss:$16 sps:$4 sm:$0xff]  }
  0x44   :  { %1083 = vmatpush2.bf16.msra.mxu0 %v2630_v6  ;;  %1126 = vmatpush2.bf16.msra.mxu1 %v2633_v7  ;;  %v2662_v7 = vld [vmem:[%s3941_s3 + $0xcc] ss:$16 sps:$4 sm:$0xff]  }
  0x45   :  { %1084 = vmatprep.subr.bf16.mxu0 %v2638_v8  ;;  %1127 = vmatprep.subr.bf16.mxu1 %v2641_v9  ;;  %v2665_v8 = vld [vmem:[%s3941_s3 + $0x2cc] ss:$16 sps:$4 sm:$0xff]   ;;  %v2660_v9 = vld [vmem:[%s3941_s3 + $0xc8] ss:$16 sps:$4 sm:$0xff]  }
  0x48   :  { %1085 = vmatpush2.bf16.msra.mxu0 %v2636_v10  ;;  %1128 = vmatpush2.bf16.msra.mxu1 %v2639_v11  ;;  %v2663_v10 = vld [vmem:[%s3941_s3 + $0x2c8] ss:$16 sps:$4 sm:$0xff]   ;;  %v2668_v11 = vld [vmem:[%s3941_s3 + $0xac] ss:$16 sps:$4 sm:$0xff]  }
  0x49   :  { %1086 = vmatprep.subr.bf16.mxu0 %v2644_v12  ;;  %1129 = vmatprep.subr.bf16.mxu1 %v2647_v13  ;;  %v2671_v12 = vld [vmem:[%s3941_s3 + $0x2ac] ss:$16 sps:$4 sm:$0xff]   ;;  %v2666_v13 = vld [vmem:[%s3941_s3 + $0xa8] ss:$16 sps:$4 sm:$0xff]  }
  0x4c   :  { %1087 = vmatpush2.bf16.msra.mxu0 %v2642_v14  ;;  %1130 = vmatpush2.bf16.msra.mxu1 %v2645_v15  ;;  %v2669_v14 = vld [vmem:[%s3941_s3 + $0x2a8] ss:$16 sps:$4 sm:$0xff]   ;;  %v2674_v15 = vld [vmem:[%s3941_s3 + $0x8c] ss:$16 sps:$4 sm:$0xff]  }
  0x4d   :  { %1088 = vmatprep.subr.bf16.mxu0 %v2650_v16  ;;  %1131 = vmatprep.subr.bf16.mxu1 %v2653_v17  ;;  %v2677_v16 = vld [vmem:[%s3941_s3 + $0x28c] ss:$16 sps:$4 sm:$0xff]   ;;  %v2672_v17 = vld [vmem:[%s3941_s3 + $0x88] ss:$16 sps:$4 sm:$0xff]  }
  0x50   :  { %1089 = vmatpush2.bf16.msra.mxu0 %v2648_v18  ;;  %1132 = vmatpush2.bf16.msra.mxu1 %v2651_v19  ;;  %v2675_v18 = vld [vmem:[%s3941_s3 + $0x288] ss:$16 sps:$4 sm:$0xff]   ;;  %v2680_v19 = vld [vmem:[%s3941_s3 + $0x6c] ss:$16 sps:$4 sm:$0xff]  }
  0x51   :  { %1144 = vmatprep.subr.bf16.mxu0 %v2656_v20  ;;  %1187 = vmatprep.subr.bf16.mxu1 %v2659_v21  ;;  %v2683_v20 = vld [vmem:[%s3941_s3 + $0x26c] ss:$16 sps:$4 sm:$0xff]   ;;  %v2678_v21 = vld [vmem:[%s3941_s3 + $0x68] ss:$16 sps:$4 sm:$0xff]  }
  0xd3   :  { %v196_v31 = vpop.f32.mrf.mxu0  ;;  %v239_v34 = vpop.f32.mrf.mxu1 }
  0xd4   :  { %v197_v38 = vadd.f32 %v196_v31, %v61_v30  ;;  %v240_v41 = vadd.f32 %v239_v34, %v69_v33  ;;  %v2687_v31 = vld [vmem:[%s3941_s3 + $0x248] ss:$16 sps:$4 sm:$0xff]  }
  0xd5   :  { %v198_v35 = vpop.f32.mrf.mxu0  ;;  %v241_v37 = vpop.f32.mrf.mxu1  ;;  %v2690_v34 = vld [vmem:[%s3941_s3 + $0x28] ss:$16 sps:$4 sm:$0xff]  }
  0xd6   :  { %v199_v36 = vadd.f32 %v198_v35, %v65_v29  ;;  %v242_v39 = vadd.f32 %v241_v37, %v73_v32  ;;  %v248_v50 = vmul.f32 0.2, %v197_v38  ;;  %v250_v54 = vmul.f32 0.2, %v240_v41  ;;  %v2693_v35 = vld [vmem:[%s3941_s3 + $0x228] ss:$16 sps:$4 sm:$0xff]  }
  0xd7   :  { %v200_v40 = vpop.f32.mrf.mxu0  ;;  %v243_v43 = vpop.f32.mrf.mxu1  ;;  %v2701_v37 = vld [vmem:[%s3941_s3 + $0x20c] ss:$16 sps:$4 sm:$0xff]  }
  0xd8   :  { %v201_v42 = vadd.f32 %v200_v40, %v61_v30  ;;  %v244_v44 = vadd.f32 %v243_v43, %v69_v33  ;;  %v249_v46 = vmul.f32 0.2, %v199_v36  ;;  %v251_v51 = vmul.f32 0.2, %v242_v39  ;;  %v2684_v30 = vld [vmem:[%s3941_s3 + $0x48] ss:$16 sps:$4 sm:$0xff]  }
  0xd9   :  { %v202_v45 = vpop.f32.mrf.mxu0  ;;  %v245_v49 = vpop.f32.mrf.mxu1  ;;  %v256_v61 = vmax.f32 %v197_v38, %v248_v50  ;;  %v258_v0 = vmax.f32 %v240_v41, %v250_v54  ;;  %v2695_v33 = vld [vmem:[%s3941_s3 + $0x22c] ss:$16 sps:$4 sm:$0xff]   ;;  %v2696_v38 = vld [vmem:[%s3941_s3 + $0x8] ss:$16 sps:$4 sm:$0xff]  }
  0xda   :  { %v252_v47 = vmul.f32 0.2, %v201_v42  ;;  %v203_v48 = vadd.f32 %v202_v45, %v65_v29  ;;  %v254_v52 = vmul.f32 0.2, %v244_v44  ;;  %v246_v53 = vadd.f32 %v245_v49, %v73_v32  ;;  %v2689_v29 = vld [vmem:[%s3941_s3 + $0x24c] ss:$16 sps:$4 sm:$0xff]  }
  0xdb   :  { %v257_v58 = vmax.f32 %v199_v36, %v249_v46  ;;  %v259_v62 = vmax.f32 %v242_v39, %v251_v51  ;;  %v2692_v32 = vld [vmem:[%s3941_s3 + $0x2c] ss:$16 sps:$4 sm:$0xff]   ;;  %v2699_v39 = vld [vmem:[%s3941_s3 + $0x208] ss:$16 sps:$4 sm:$0xff]  }
  0xdc   :  { %v253_v55 = vmul.f32 0.2, %v203_v48  ;;  %v260_v56 = vmax.f32 %v201_v42, %v252_v47  ;;  %v255_v57 = vmul.f32 0.2, %v246_v53  ;;  %v262_v59 = vmax.f32 %v244_v44, %v254_v52  ;;  %v2698_v36 = vld [vmem:[%s3941_s3 + $0xc] ss:$16 sps:$4 sm:$0xff]  }
  0xdd   :  { %v2704_v40 = vld [vmem:[%s3941_s3 + $0x1ec] ss:$16 sps:$4 sm:$0xff]   ;;  %v2702_v42 = vld [vmem:[%s3941_s3 + $0x1e8] ss:$16 sps:$4 sm:$0xff]  }
  0xde   :  { %v261_v60 = vmax.f32 %v203_v48, %v253_v55  ;;  %v263_v63 = vmax.f32 %v246_v53, %v255_v57  ;;  %v3320_v3 = vpack.c.bf16 %v260_v56, %v256_v61  ;;  %v3325_v6 = vpack.c.bf16 %v262_v59, %v258_v0  ;;  %v2707_v41 = vld [vmem:[%s3941_s3 + $0x3ec] ss:$16 sps:$4 sm:$0xff]   ;;  %v2705_v43 = vld [vmem:[%s3941_s3 + $0x3e8] ss:$16 sps:$4 sm:$0xff]  }
  0xdf   :  { %v2710_v44 = vld [vmem:[%s3941_s3 + $0x1cc] ss:$16 sps:$4 sm:$0xff]   ;;  %v2708_v46 = vld [vmem:[%s3941_s3 + $0x1c8] ss:$16 sps:$4 sm:$0xff]  }
  0xe0   :  { %v265_v1 = vpack.c.bf16 %v261_v60, %v257_v58  ;;  %v267_v4 = vpack.c.bf16 %v263_v63, %v259_v62  ;;  %v2713_v45 = vld [vmem:[%s3941_s3 + $0x3cc] ss:$16 sps:$4 sm:$0xff]   ;;  %v2711_v47 = vld [vmem:[%s3941_s3 + $0x3c8] ss:$16 sps:$4 sm:$0xff]  }
  0xe1   :  { %v2716_v48 = vld [vmem:[%s3941_s3 + $0x1ac] ss:$16 sps:$4 sm:$0xff]   ;;  %v2714_v50 = vld [vmem:[%s3941_s3 + $0x1a8] ss:$16 sps:$4 sm:$0xff]  }
  0xe2   :  { %1090 = vmatprep.mubr.bf16.mxu0 %v265_v1  ;;  %1133 = vmatprep.mubr.bf16.mxu1 %v267_v4  ;;  %v2719_v49 = vld [vmem:[%s3941_s3 + $0x3ac] ss:$16 sps:$4 sm:$0xff]   ;;  %v2717_v51 = vld [vmem:[%s3941_s3 + $0x3a8] ss:$16 sps:$4 sm:$0xff]  }
  0xe3   :  { %1091 = vmatmul.mubr.bf16.vlgmr.msra.gmra.mxu0 %v3320_v3  ;;  %1134 = vmatmul.mubr.bf16.vlgmr.msra.gmra.mxu1 %v3325_v6  ;;  %v2722_v52 = vld [vmem:[%s3941_s3 + $0x18c] ss:$16 sps:$4 sm:$0xff]   ;;  %v2720_v54 = vld [vmem:[%s3941_s3 + $0x188] ss:$16 sps:$4 sm:$0xff]  }
  0xe4   :  { %1145 = vmatpush1.bf16.msra.mxu0 %v2654_v2  ;;  %1188 = vmatpush1.bf16.msra.mxu1 %v2657_v5  ;;  %v2725_v53 = vld [vmem:[%s3941_s3 + $0x38c] ss:$16 sps:$4 sm:$0xff]   ;;  %v2723_v55 = vld [vmem:[%s3941_s3 + $0x388] ss:$16 sps:$4 sm:$0xff]  }
  0xe5   :  { %1176 = vmatprep.mubr.bf16.mxu0 %v265_v1  ;;  %1219 = vmatprep.mubr.bf16.mxu1 %v267_v4  ;;  %v2728_v56 = vld [vmem:[%s3941_s3 + $0x16c] ss:$16 sps:$4 sm:$0xff]   ;;  %v2726_v58 = vld [vmem:[%s3941_s3 + $0x168] ss:$16 sps:$4 sm:$0xff]  }
  0xe6   :  { %1146 = vmatprep.subr.bf16.mxu0 %v2662_v7  ;;  %1189 = vmatprep.subr.bf16.mxu1 %v2665_v8  ;;  %v2731_v57 = vld [vmem:[%s3941_s3 + $0x36c] ss:$16 sps:$4 sm:$0xff]   ;;  %v2729_v59 = vld [vmem:[%s3941_s3 + $0x368] ss:$16 sps:$4 sm:$0xff]  }
  0xe7   :  { %v2734_v60 = vld [vmem:[%s3941_s3 + $0x14c] ss:$16 sps:$4 sm:$0xff]   ;;  %v2732_v62 = vld [vmem:[%s3941_s3 + $0x148] ss:$16 sps:$4 sm:$0xff]  }
  0xe8   :  { %1147 = vmatpush1.bf16.msra.mxu0 %v2660_v9  ;;  %1190 = vmatpush1.bf16.msra.mxu1 %v2663_v10  ;;  %v2737_v61 = vld [vmem:[%s3941_s3 + $0x34c] ss:$16 sps:$4 sm:$0xff]   ;;  %v2735_v63 = vld [vmem:[%s3941_s3 + $0x348] ss:$16 sps:$4 sm:$0xff]  }
  0xe9   :  { %1148 = vmatprep.subr.bf16.mxu0 %v2668_v11  ;;  %1191 = vmatprep.subr.bf16.mxu1 %v2671_v12  ;;  %v2740_v0 = vld [vmem:[%s3941_s3 + $0x12c] ss:$16 sps:$4 sm:$0xff]   ;;  %v2738_v2 = vld [vmem:[%s3941_s3 + $0x128] ss:$16 sps:$4 sm:$0xff]  }
  0xea   :  { %v2743_v1 = vld [vmem:[%s3941_s3 + $0x32c] ss:$16 sps:$4 sm:$0xff]   ;;  %v2741_v4 = vld [vmem:[%s3941_s3 + $0x328] ss:$16 sps:$4 sm:$0xff]  }
  0xeb   :  { %v2746_v5 = vld [vmem:[%s3941_s3 + $0x10c] ss:$16 sps:$4 sm:$0xff]   ;;  %v2744_v8 = vld [vmem:[%s3941_s3 + $0x108] ss:$16 sps:$4 sm:$0xff]  }
  0xec   :  { %1149 = vmatpush1.bf16.msra.mxu0 %v2666_v13  ;;  %1192 = vmatpush1.bf16.msra.mxu1 %v2669_v14  ;;  %v2749_v7 = vld [vmem:[%s3941_s3 + $0x30c] ss:$16 sps:$4 sm:$0xff]   ;;  %v2747_v9 = vld [vmem:[%s3941_s3 + $0x308] ss:$16 sps:$4 sm:$0xff]  }
  0xed   :  { %1150 = vmatprep.subr.bf16.mxu0 %v2674_v15  ;;  %1193 = vmatprep.subr.bf16.mxu1 %v2677_v16  ;;  %v2752_v10 = vld [vmem:[%s3943_s5 + $0x74] ss:$8 sps:$4 sm:$0xff]   ;;  %v2750_v11 = vld [vmem:[%s3943_s5 + $0x70] ss:$8 sps:$4 sm:$0xff]   ;;  %v2755_v12 = vld [vmem:[%s3943_s5 + $0x64] ss:$8 sps:$4 sm:$0xff]  }
  0xee   :  { %v2753_v13 = vld [vmem:[%s3943_s5 + $0x60] ss:$8 sps:$4 sm:$0xff]   ;;  %v2758_v14 = vld [vmem:[%s3943_s5 + $0x54] ss:$8 sps:$4 sm:$0xff]   ;;  %v2756_v15 = vld [vmem:[%s3943_s5 + $0x50] ss:$8 sps:$4 sm:$0xff]  }
  0xef   :  { %v2764_v16 = vld [vmem:[%s3943_s5 + $0x34] ss:$8 sps:$4 sm:$0xff]  }
  0xf0   :  { %1151 = vmatpush1.bf16.msra.mxu0 %v2672_v17  ;;  %1194 = vmatpush1.bf16.msra.mxu1 %v2675_v18  ;;  %v2762_v17 = vld [vmem:[%s3943_s5 + $0x30] ss:$8 sps:$4 sm:$0xff]  }
  0xf1   :  { %1152 = vmatprep.subr.bf16.mxu0 %v2680_v19  ;;  %1195 = vmatprep.subr.bf16.mxu1 %v2683_v20  ;;  %v2798_v18 = vld [vmem:[%s3943_s5 + $0x170] ss:$8 sps:$4 sm:$0xff]   ;;  %v2767_v19 = vld [vmem:[%s3943_s5 + $0x24] ss:$8 sps:$4 sm:$0xff]   ;;  %v2800_v20 = vld [vmem:[%s3943_s5 + $0x174] ss:$8 sps:$4 sm:$0xff]  }
  0xf4   :  { %1153 = vmatpush1.bf16.msra.mxu0 %v2678_v21  ;;  %1196 = vmatpush1.bf16.msra.mxu1 %v2681_v22  ;;  %v2765_v21 = vld [vmem:[%s3943_s5 + $0x20] ss:$8 sps:$4 sm:$0xff]   ;;  %v2770_v22 = vld [vmem:[%s3943_s5 + $0x14] ss:$8 sps:$4 sm:$0xff]  }
  0xf5   :  { %1154 = vmatprep.subr.bf16.mxu0 %v2686_v27  ;;  %1197 = vmatprep.subr.bf16.mxu1 %v2689_v29  ;;  %v2804_v27 = vld [vmem:[%s3943_s5 + $0x160] ss:$8 sps:$4 sm:$0xff]   ;;  %v2806_v29 = vld [vmem:[%s3943_s5 + $0x164] ss:$8 sps:$4 sm:$0xff]  }
  0xf8   :  { %1155 = vmatpush1.bf16.msra.mxu0 %v2684_v30  ;;  %1198 = vmatpush1.bf16.msra.mxu1 %v2687_v31  ;;  %v2768_v30 = vld [vmem:[%s3943_s5 + $0x10] ss:$8 sps:$4 sm:$0xff]   ;;  %v2773_v31 = vld [vmem:[%s3943_s5 + $0x4] ss:$8 sps:$4 sm:$0xff]  }
  0xf9   :  { %1156 = vmatprep.subr.bf16.mxu0 %v2692_v32  ;;  %1199 = vmatprep.subr.bf16.mxu1 %v2695_v33  ;;  %v2810_v32 = vld [vmem:[%s3943_s5 + $0x150] ss:$8 sps:$4 sm:$0xff]   ;;  %v2812_v33 = vld [vmem:[%s3943_s5 + $0x154] ss:$8 sps:$4 sm:$0xff]  }
  0xfc   :  { %1157 = vmatpush1.bf16.msra.mxu0 %v2690_v34  ;;  %1200 = vmatpush1.bf16.msra.mxu1 %v2693_v35  ;;  %v2771_v34 = vld [vmem:[%s3943_s5] ss:$8 sps:$4 sm:$0xff]   ;;  %v2776_v35 = vld [vmem:[%s3943_s5 + $0xf4] ss:$8 sps:$4 sm:$0xff]  }
  0xfd   :  { %1158 = vmatprep.subr.bf16.mxu0 %v2698_v36  ;;  %1201 = vmatprep.subr.bf16.mxu1 %v2701_v37  ;;  %v2816_v36 = vld [vmem:[%s3943_s5 + $0x140] ss:$8 sps:$4 sm:$0xff]   ;;  %v2818_v37 = vld [vmem:[%s3943_s5 + $0x144] ss:$8 sps:$4 sm:$0xff]  }
 0x100   :  { %1159 = vmatpush1.bf16.msra.mxu0 %v2696_v38  ;;  %1202 = vmatpush1.bf16.msra.mxu1 %v2699_v39  ;;  %v2774_v38 = vld [vmem:[%s3943_s5 + $0xf0] ss:$8 sps:$4 sm:$0xff]   ;;  %v2779_v39 = vld [vmem:[%s3943_s5 + $0xe4] ss:$8 sps:$4 sm:$0xff]  }
 0x101   :  { %1160 = vmatprep.subr.bf16.mxu0 %v2704_v40  ;;  %1203 = vmatprep.subr.bf16.mxu1 %v2707_v41  ;;  %v2822_v40 = vld [vmem:[%s3943_s5 + $0x130] ss:$8 sps:$4 sm:$0xff]   ;;  %v2824_v41 = vld [vmem:[%s3943_s5 + $0x134] ss:$8 sps:$4 sm:$0xff]  }
 0x104   :  { %1161 = vmatpush2.bf16.msra.mxu0 %v2702_v42  ;;  %1204 = vmatpush2.bf16.msra.mxu1 %v2705_v43  ;;  %v2777_v42 = vld [vmem:[%s3943_s5 + $0xe0] ss:$8 sps:$4 sm:$0xff]   ;;  %v2782_v43 = vld [vmem:[%s3943_s5 + $0xd4] ss:$8 sps:$4 sm:$0xff]  }
 0x105   :  { %1162 = vmatprep.subr.bf16.mxu0 %v2710_v44  ;;  %1205 = vmatprep.subr.bf16.mxu1 %v2713_v45  ;;  %v2828_v44 = vld [vmem:[%s3943_s5 + $0x120] ss:$8 sps:$4 sm:$0xff]   ;;  %v2830_v45 = vld [vmem:[%s3943_s5 + $0x124] ss:$8 sps:$4 sm:$0xff]  }
 0x108   :  { %1163 = vmatpush2.bf16.msra.mxu0 %v2708_v46  ;;  %1206 = vmatpush2.bf16.msra.mxu1 %v2711_v47  ;;  %v2780_v46 = vld [vmem:[%s3943_s5 + $0xd0] ss:$8 sps:$4 sm:$0xff]   ;;  %v2785_v47 = vld [vmem:[%s3943_s5 + $0xc4] ss:$8 sps:$4 sm:$0xff]  }
 0x109   :  { %1164 = vmatprep.subr.bf16.mxu0 %v2716_v48  ;;  %1207 = vmatprep.subr.bf16.mxu1 %v2719_v49  ;;  %v2834_v48 = vld [vmem:[%s3943_s5 + $0x110] ss:$8 sps:$4 sm:$0xff]   ;;  %v2836_v49 = vld [vmem:[%s3943_s5 + $0x114] ss:$8 sps:$4 sm:$0xff]  }
 0x10c   :  { %1165 = vmatpush2.bf16.msra.mxu0 %v2714_v50  ;;  %1208 = vmatpush2.bf16.msra.mxu1 %v2717_v51  ;;  %v2783_v50 = vld [vmem:[%s3943_s5 + $0xc0] ss:$8 sps:$4 sm:$0xff]   ;;  %v2788_v51 = vld [vmem:[%s3943_s5 + $0xb4] ss:$8 sps:$4 sm:$0xff]  }
 0x10d   :  { %1166 = vmatprep.subr.bf16.mxu0 %v2722_v52  ;;  %1209 = vmatprep.subr.bf16.mxu1 %v2725_v53  ;;  %v2840_v52 = vld [vmem:[%s3943_s5 + $0x100] ss:$8 sps:$4 sm:$0xff]   ;;  %v2842_v53 = vld [vmem:[%s3943_s5 + $0x104] ss:$8 sps:$4 sm:$0xff]  }
 0x110   :  { %1167 = vmatpush2.bf16.msra.mxu0 %v2720_v54  ;;  %1210 = vmatpush2.bf16.msra.mxu1 %v2723_v55  ;;  %v2786_v54 = vld [vmem:[%s3943_s5 + $0xb0] ss:$8 sps:$4 sm:$0xff]   ;;  %v2791_v55 = vld [vmem:[%s3943_s5 + $0xa4] ss:$8 sps:$4 sm:$0xff]  }
 0x111   :  { %1168 = vmatprep.subr.bf16.mxu0 %v2728_v56  ;;  %1211 = vmatprep.subr.bf16.mxu1 %v2731_v57  ;;  %v2846_v56 = vld [vmem:[%s3943_s5 + $0x1f0] ss:$8 sps:$4 sm:$0xff]   ;;  %v2848_v57 = vld [vmem:[%s3943_s5 + $0x1f4] ss:$8 sps:$4 sm:$0xff]  }
 0x114   :  { %1169 = vmatpush2.bf16.msra.mxu0 %v2726_v58  ;;  %1212 = vmatpush2.bf16.msra.mxu1 %v2729_v59  ;;  %v2789_v58 = vld [vmem:[%s3943_s5 + $0xa0] ss:$8 sps:$4 sm:$0xff]   ;;  %v2794_v59 = vld [vmem:[%s3943_s5 + $0x94] ss:$8 sps:$4 sm:$0xff]  }
 0x115   :  { %1170 = vmatprep.subr.bf16.mxu0 %v2734_v60  ;;  %1213 = vmatprep.subr.bf16.mxu1 %v2737_v61  ;;  %v2852_v60 = vld [vmem:[%s3943_s5 + $0x1e0] ss:$8 sps:$4 sm:$0xff]   ;;  %v2854_v61 = vld [vmem:[%s3943_s5 + $0x1e4] ss:$8 sps:$4 sm:$0xff]  }
 0x118   :  { %1171 = vmatpush2.bf16.msra.mxu0 %v2732_v62  ;;  %1214 = vmatpush2.bf16.msra.mxu1 %v2735_v63  ;;  %v2792_v62 = vld [vmem:[%s3943_s5 + $0x90] ss:$8 sps:$4 sm:$0xff]   ;;  %v2797_v63 = vld [vmem:[%s3943_s5 + $0x84] ss:$8 sps:$4 sm:$0xff]  }
 0x119   :  { %1172 = vmatprep.subr.bf16.mxu0 %v2740_v0  ;;  %1215 = vmatprep.subr.bf16.mxu1 %v2743_v1  ;;  %v2858_v0 = vld [vmem:[%s3943_s5 + $0x1d0] ss:$8 sps:$4 sm:$0xff]   ;;  %v2860_v1 = vld [vmem:[%s3943_s5 + $0x1d4] ss:$8 sps:$4 sm:$0xff]  }
 0x11c   :  { %1173 = vmatpush2.bf16.msra.mxu0 %v2738_v2  ;;  %1216 = vmatpush2.bf16.msra.mxu1 %v2741_v4  ;;  %v2795_v2 = vld [vmem:[%s3943_s5 + $0x80] ss:$8 sps:$4 sm:$0xff]   ;;  %v2803_v4 = vld [vmem:[%s3945_s7 + $0x74] ss:$8 sps:$4 sm:$0xff]  }
 0x11d   :  { %1174 = vmatprep.subr.bf16.mxu0 %v2746_v5  ;;  %1217 = vmatprep.subr.bf16.mxu1 %v2749_v7  ;;  %v2864_v5 = vld [vmem:[%s3943_s5 + $0x1c0] ss:$8 sps:$4 sm:$0xff]   ;;  %v2866_v7 = vld [vmem:[%s3943_s5 + $0x1c4] ss:$8 sps:$4 sm:$0xff]  }
 0x120   :  { %1175 = vmatpush2.bf16.msra.mxu0 %v2744_v8  ;;  %1218 = vmatpush2.bf16.msra.mxu1 %v2747_v9  ;;  %v2872_v8 = vld [vmem:[%s3943_s5 + $0x1b4] ss:$8 sps:$4 sm:$0xff]   ;;  %v2870_v9 = vld [vmem:[%s3943_s5 + $0x1b0] ss:$8 sps:$4 sm:$0xff]  }
 0x121   :  { %1646 = vmatprep.subr.bf16.mxu0 %v2752_v10  ;;  %1689 = vmatprep.subr.bf16.mxu1 %v2800_v20  ;;  %v2878_v10 = vld [vmem:[%s3943_s5 + $0x1a4] ss:$8 sps:$4 sm:$0xff]  }
 0x123   :  { %1177 = vmatmul.mubr.bf16.vlgmr.msra.gmra.mxu0 %v3320_v3  ;;  %1220 = vmatmul.mubr.bf16.vlgmr.msra.gmra.mxu1 %v3325_v6  ;;  %v2761_v3 = vld [vmem:[%s3943_s5 + $0x44] ss:$8 sps:$4 sm:$0xff]   ;;  %v2759_v6 = vld [vmem:[%s3943_s5 + $0x40] ss:$8 sps:$4 sm:$0xff]  }
 0x124   :  { %1647 = vmatpush1.bf16.msra.mxu0 %v2750_v11  ;;  %1690 = vmatpush1.bf16.msra.mxu1 %v2798_v18  ;;  %v2876_v11 = vld [vmem:[%s3943_s5 + $0x1a0] ss:$8 sps:$4 sm:$0xff]  }
 0x125   :  { %1648 = vmatprep.subr.bf16.mxu0 %v2755_v12  ;;  %1691 = vmatprep.subr.bf16.mxu1 %v2806_v29  ;;  %v2884_v12 = vld [vmem:[%s3943_s5 + $0x194] ss:$8 sps:$4 sm:$0xff]  }
 0x128   :  { %1649 = vmatpush1.bf16.msra.mxu0 %v2753_v13  ;;  %1692 = vmatpush1.bf16.msra.mxu1 %v2804_v27  ;;  %v2882_v13 = vld [vmem:[%s3943_s5 + $0x190] ss:$8 sps:$4 sm:$0xff]  }
 0x129   :  { %1650 = vmatprep.subr.bf16.mxu0 %v2758_v14  ;;  %1693 = vmatprep.subr.bf16.mxu1 %v2812_v33  ;;  %v2890_v14 = vld [vmem:[%s3943_s5 + $0x184] ss:$8 sps:$4 sm:$0xff]  }
 0x12c   :  { %1651 = vmatpush1.bf16.msra.mxu0 %v2756_v15  ;;  %1694 = vmatpush1.bf16.msra.mxu1 %v2810_v32  ;;  %v2888_v15 = vld [vmem:[%s3943_s5 + $0x180] ss:$8 sps:$4 sm:$0xff]  }
 0x12d   :  { %1652 = vmatprep.subr.bf16.mxu0 %v2761_v3  ;;  %1695 = vmatprep.subr.bf16.mxu1 %v2818_v37  ;;  %v2896_v3 = vld [vmem:[%s3945_s7 + $0x174] ss:$8 sps:$4 sm:$0xff]  }
 0x130   :  { %1653 = vmatpush1.bf16.msra.mxu0 %v2759_v6  ;;  %1696 = vmatpush1.bf16.msra.mxu1 %v2816_v36  ;;  %v3712_v6 = vld [vmem:[%s3942_s4] sm:$0xf] }
 0x131   :  { %1654 = vmatprep.subr.bf16.mxu0 %v2764_v16  ;;  %1697 = vmatprep.subr.bf16.mxu1 %v2824_v41  ;;  %v401_v16 = vrot.slane %v3712_v6, %v3304_v25 }
 0x134   :  { %1655 = vmatpush1.bf16.msra.mxu0 %v2762_v17  ;;  %1698 = vmatpush1.bf16.msra.mxu1 %v2822_v40  ;;  %v405_v17 = vrot.slane %v3712_v6, %v3301_v24 }
 0x135   :  { %1656 = vmatprep.subr.bf16.mxu0 %v2767_v19  ;;  %1699 = vmatprep.subr.bf16.mxu1 %v2830_v45 }
 0x138   :  { %1657 = vmatpush1.bf16.msra.mxu0 %v2765_v21  ;;  %1700 = vmatpush1.bf16.msra.mxu1 %v2828_v44 }
 0x139   :  { %1658 = vmatprep.subr.bf16.mxu0 %v2770_v22  ;;  %1701 = vmatprep.subr.bf16.mxu1 %v2836_v49 }
 0x13c   :  { %1659 = vmatpush1.bf16.msra.mxu0 %v2768_v30  ;;  %1702 = vmatpush1.bf16.msra.mxu1 %v2834_v48  ;;  %v2801_v48 = vld [vmem:[%s3945_s7 + $0x70] ss:$8 sps:$4 sm:$0xff]  }
 0x13d   :  { %1660 = vmatprep.subr.bf16.mxu0 %v2773_v31  ;;  %1703 = vmatprep.subr.bf16.mxu1 %v2842_v53  ;;  %v2813_v53 = vld [vmem:[%s3945_s7 + $0x50] ss:$8 sps:$4 sm:$0xff]  }
 0x140   :  { %1661 = vmatpush1.bf16.msra.mxu0 %v2771_v34  ;;  %1704 = vmatpush1.bf16.msra.mxu1 %v2840_v52  ;;  %v2815_v52 = vld [vmem:[%s3945_s7 + $0x54] ss:$8 sps:$4 sm:$0xff]  }
 0x141   :  { %1662 = vmatprep.subr.bf16.mxu0 %v2776_v35  ;;  %1705 = vmatprep.subr.bf16.mxu1 %v2848_v57  ;;  %v2825_v57 = vld [vmem:[%s3945_s7 + $0x30] ss:$8 sps:$4 sm:$0xff]  }
 0x144   :  { %1663 = vmatpush2.bf16.msra.mxu0 %v2774_v38  ;;  %1706 = vmatpush2.bf16.msra.mxu1 %v2846_v56  ;;  %v2827_v56 = vld [vmem:[%s3945_s7 + $0x34] ss:$8 sps:$4 sm:$0xff]  }
 0x145   :  { %1664 = vmatprep.subr.bf16.mxu0 %v2779_v39  ;;  %1707 = vmatprep.subr.bf16.mxu1 %v2854_v61  ;;  %v2837_v61 = vld [vmem:[%s3945_s7 + $0x10] ss:$8 sps:$4 sm:$0xff]  }
 0x148   :  { %1665 = vmatpush2.bf16.msra.mxu0 %v2777_v42  ;;  %1708 = vmatpush2.bf16.msra.mxu1 %v2852_v60  ;;  %v2839_v60 = vld [vmem:[%s3945_s7 + $0x14] ss:$8 sps:$4 sm:$0xff]  }
 0x149   :  { %1666 = vmatprep.subr.bf16.mxu0 %v2782_v43  ;;  %1709 = vmatprep.subr.bf16.mxu1 %v2860_v1  ;;  %v2849_v1 = vld [vmem:[%s3945_s7 + $0xf0] ss:$8 sps:$4 sm:$0xff]  }
 0x14c   :  { %1667 = vmatpush2.bf16.msra.mxu0 %v2780_v46  ;;  %1710 = vmatpush2.bf16.msra.mxu1 %v2858_v0  ;;  %v2851_v0 = vld [vmem:[%s3945_s7 + $0xf4] ss:$8 sps:$4 sm:$0xff]  }
 0x14d   :  { %1668 = vmatprep.subr.bf16.mxu0 %v2785_v47  ;;  %1711 = vmatprep.subr.bf16.mxu1 %v2866_v7  ;;  %v2861_v7 = vld [vmem:[%s3945_s7 + $0xd0] ss:$8 sps:$4 sm:$0xff]  }
 0x150   :  { %1669 = vmatpush2.bf16.msra.mxu0 %v2783_v50  ;;  %1712 = vmatpush2.bf16.msra.mxu1 %v2864_v5  ;;  %v2809_v50 = vld [vmem:[%s3945_s7 + $0x64] ss:$8 sps:$4 sm:$0xff]   ;;  %v2863_v5 = vld [vmem:[%s3945_s7 + $0xd4] ss:$8 sps:$4 sm:$0xff]  }
 0x151   :  { %1670 = vmatprep.subr.bf16.mxu0 %v2788_v51  ;;  %1713 = vmatprep.subr.bf16.mxu1 %v2872_v8  ;;  %v2807_v51 = vld [vmem:[%s3945_s7 + $0x60] ss:$8 sps:$4 sm:$0xff]   ;;  %v2869_v8 = vld [vmem:[%s3945_s7 + $0xc4] ss:$8 sps:$4 sm:$0xff]  }
 0x154   :  { %1671 = vmatpush2.bf16.msra.mxu0 %v2786_v54  ;;  %1714 = vmatpush2.bf16.msra.mxu1 %v2870_v9  ;;  %v2821_v54 = vld [vmem:[%s3945_s7 + $0x44] ss:$8 sps:$4 sm:$0xff]   ;;  %v2867_v9 = vld [vmem:[%s3945_s7 + $0xc0] ss:$8 sps:$4 sm:$0xff]  }
 0x155   :  { %1672 = vmatprep.subr.bf16.mxu0 %v2791_v55  ;;  %1715 = vmatprep.subr.bf16.mxu1 %v2878_v10  ;;  %v2819_v55 = vld [vmem:[%s3945_s7 + $0x40] ss:$8 sps:$4 sm:$0xff]   ;;  %v2875_v10 = vld [vmem:[%s3945_s7 + $0xb4] ss:$8 sps:$4 sm:$0xff]  }
 0x158   :  { %1673 = vmatpush2.bf16.msra.mxu0 %v2789_v58  ;;  %1716 = vmatpush2.bf16.msra.mxu1 %v2876_v11  ;;  %v2833_v58 = vld [vmem:[%s3945_s7 + $0x24] ss:$8 sps:$4 sm:$0xff]   ;;  %v409_v11 = vrot.slane %v3712_v6, %v68_v28 }
 0x159   :  { %1674 = vmatprep.subr.bf16.mxu0 %v2794_v59  ;;  %1717 = vmatprep.subr.bf16.mxu1 %v2884_v12  ;;  %v2831_v59 = vld [vmem:[%s3945_s7 + $0x20] ss:$8 sps:$4 sm:$0xff]   ;;  %v413_v12 = vrot.slane %v3712_v6, %v72_v26  ;;  %v2887_v6 = vld [vmem:[%s3945_s7 + $0x94] ss:$8 sps:$4 sm:$0xff]  }
 0x15c   :  { %1675 = vmatpush2.bf16.msra.mxu0 %v2792_v62  ;;  %1718 = vmatpush2.bf16.msra.mxu1 %v2882_v13  ;;  %v2845_v62 = vld [vmem:[%s3945_s7 + $0x4] ss:$8 sps:$4 sm:$0xff]   ;;  %v2873_v13 = vld [vmem:[%s3945_s7 + $0xb0] ss:$8 sps:$4 sm:$0xff]  }
 0x15d   :  { %1676 = vmatprep.subr.bf16.mxu0 %v2797_v63  ;;  %1719 = vmatprep.subr.bf16.mxu1 %v2890_v14  ;;  %v2843_v63 = vld [vmem:[%s3945_s7] ss:$8 sps:$4 sm:$0xff]  }
 0x160   :  { %1677 = vmatpush2.bf16.msra.mxu0 %v2795_v2  ;;  %1720 = vmatpush2.bf16.msra.mxu1 %v2888_v15  ;;  %v2857_v2 = vld [vmem:[%s3945_s7 + $0xe4] ss:$8 sps:$4 sm:$0xff]  }
 0x161   :  { %2133 = vmatprep.subr.bf16.mxu0 %v2803_v4  ;;  %2176 = vmatprep.subr.bf16.mxu1 %v2896_v3  ;;  %v2855_v4 = vld [vmem:[%s3945_s7 + $0xe0] ss:$8 sps:$4 sm:$0xff]   ;;  %v2881_v15 = vld [vmem:[%s3945_s7 + $0xa4] ss:$8 sps:$4 sm:$0xff]  }
 0x1a3   :  { %v1092_v18 = vpop.f32.mrf.mxu0  ;;  %v1135_v19 = vpop.f32.mrf.mxu1 }
 0x1a4   :  { %v1093_v20 = vadd.f32 %v1092_v18, %v401_v16 }
 0x1a5   :  { %v1094_v21 = vpop.f32.mrf.mxu0  ;;  %v1137_v27 = vpop.f32.mrf.mxu1 }
 0x1a6   :  { %v1095_v22 = vadd.f32 %v1094_v21, %v405_v17  ;;  %v1136_v33 = vadd.f32 %v1135_v19, %v1093_v20 }
 0x1a7   :  { %v1096_v29 = vpop.f32.mrf.mxu0  ;;  %v1139_v32 = vpop.f32.mrf.mxu1 }
 0x1a8   :  { %v1138_v30 = vadd.f32 %v1137_v27, %v1095_v22  ;;  %v1097_v31 = vadd.f32 %v1096_v29, %v401_v16  ;;  %v1230_v41 = vmul.f32 0.2, %v1136_v33 }
 0x1a9   :  { %v1098_v34 = vpop.f32.mrf.mxu0  ;;  %v1141_v37 = vpop.f32.mrf.mxu1 }
 0x1aa   :  { %v1140_v35 = vadd.f32 %v1139_v32, %v1097_v31  ;;  %v1099_v36 = vadd.f32 %v1098_v34, %v405_v17  ;;  %v1231_v38 = vmul.f32 0.2, %v1138_v30  ;;  %v1238_v46 = vmax.f32 %v1136_v33, %v1230_v41  ;;  %v2885_v31 = vld [vmem:[%s3945_s7 + $0x90] ss:$8 sps:$4 sm:$0xff]   ;;  %v2893_v33 = vld [vmem:[%s3945_s7 + $0x84] ss:$8 sps:$4 sm:$0xff]  }
 0x1ac   :  { %v1234_v39 = vmul.f32 0.2, %v1140_v35  ;;  %v1142_v40 = vadd.f32 %v1141_v37, %v1099_v36  ;;  %v1239_v44 = vmax.f32 %v1138_v30, %v1231_v38 }
 0x1ae   :  { %v1235_v42 = vmul.f32 0.2, %v1142_v40  ;;  %v1242_v43 = vmax.f32 %v1140_v35, %v1234_v39  ;;  %v2891_v39 = vld [vmem:[%s3945_s7 + $0x80] ss:$8 sps:$4 sm:$0xff]  }
 0x1b0   :  { %v1243_v45 = vmax.f32 %v1142_v40, %v1235_v42  ;;  %v3721_v49 = vpack.c.bf16 %v1242_v43, %v1238_v46 }
 0x1b2   :  { %v1247_v47 = vpack.c.bf16 %v1243_v45, %v1239_v44  ;;  %v2894_v45 = vld [vmem:[%s3945_s7 + $0x170] ss:$8 sps:$4 sm:$0xff]  }
 0x1b4   :  { %1678 = vmatprep.mubr.bf16.mxu0 %v1247_v47 }
 0x1b5   :  { %1679 = vmatmul.mubr.bf16.vlgmr.msra.gmra.mxu0 %v3721_v49 }
 0x1b6   :  { %2134 = vmatpush1.bf16.msra.mxu0 %v2801_v48  ;;  %2165 = vmatprep.mubr.bf16.mxu0 %v1247_v47  ;;  %v2899_v47 = vld [vmem:[%s3945_s7 + $0x164] ss:$8 sps:$4 sm:$0xff]   ;;  %v2897_v48 = vld [vmem:[%s3945_s7 + $0x160] ss:$8 sps:$4 sm:$0xff]  }
 0x1b7   :  { %2135 = vmatprep.subr.bf16.mxu0 %v2809_v50  ;;  %v2902_v50 = vld [vmem:[%s3945_s7 + $0x154] ss:$8 sps:$4 sm:$0xff]  }
 0x1ba   :  { %2136 = vmatpush1.bf16.msra.mxu0 %v2807_v51  ;;  %v2900_v51 = vld [vmem:[%s3945_s7 + $0x150] ss:$8 sps:$4 sm:$0xff]  }
 0x1bb   :  { %2137 = vmatprep.subr.bf16.mxu0 %v2815_v52  ;;  %v2903_v52 = vld [vmem:[%s3945_s7 + $0x140] ss:$8 sps:$4 sm:$0xff]  }
 0x1be   :  { %2138 = vmatpush1.bf16.msra.mxu0 %v2813_v53  ;;  %v2908_v53 = vld [vmem:[%s3945_s7 + $0x134] ss:$8 sps:$4 sm:$0xff]  }
 0x1bf   :  { %2139 = vmatprep.subr.bf16.mxu0 %v2821_v54  ;;  %v2906_v54 = vld [vmem:[%s3945_s7 + $0x130] ss:$8 sps:$4 sm:$0xff]  }
 0x1c2   :  { %2140 = vmatpush1.bf16.msra.mxu0 %v2819_v55  ;;  %v2911_v55 = vld [vmem:[%s3945_s7 + $0x124] ss:$8 sps:$4 sm:$0xff]  }
 0x1c3   :  { %2141 = vmatprep.subr.bf16.mxu0 %v2827_v56  ;;  %v2909_v56 = vld [vmem:[%s3945_s7 + $0x120] ss:$8 sps:$4 sm:$0xff]  }
 0x1c6   :  { %2142 = vmatpush1.bf16.msra.mxu0 %v2825_v57  ;;  %v2914_v57 = vld [vmem:[%s3945_s7 + $0x114] ss:$8 sps:$4 sm:$0xff]  }
 0x1c7   :  { %2143 = vmatprep.subr.bf16.mxu0 %v2833_v58  ;;  %v2912_v58 = vld [vmem:[%s3945_s7 + $0x110] ss:$8 sps:$4 sm:$0xff]  }
 0x1ca   :  { %2144 = vmatpush1.bf16.msra.mxu0 %v2831_v59  ;;  %v2917_v59 = vld [vmem:[%s3945_s7 + $0x104] ss:$8 sps:$4 sm:$0xff]  }
 0x1cb   :  { %2145 = vmatprep.subr.bf16.mxu0 %v2839_v60  ;;  %v2915_v60 = vld [vmem:[%s3945_s7 + $0x100] ss:$8 sps:$4 sm:$0xff]  }
 0x1ce   :  { %2146 = vmatpush1.bf16.msra.mxu0 %v2837_v61  ;;  %v2920_v61 = vld [vmem:[%s3945_s7 + $0x1f4] ss:$8 sps:$4 sm:$0xff]  }
 0x1cf   :  { %2147 = vmatprep.subr.bf16.mxu0 %v2845_v62  ;;  %v2918_v62 = vld [vmem:[%s3945_s7 + $0x1f0] ss:$8 sps:$4 sm:$0xff]  }
 0x1d2   :  { %2148 = vmatpush1.bf16.msra.mxu0 %v2843_v63  ;;  %v2923_v63 = vld [vmem:[%s3945_s7 + $0x1e4] ss:$8 sps:$4 sm:$0xff]  }
 0x1d3   :  { %2149 = vmatprep.subr.bf16.mxu0 %v2851_v0  ;;  %v2921_v0 = vld [vmem:[%s3945_s7 + $0x1e0] ss:$8 sps:$4 sm:$0xff]  }
 0x1d6   :  { %2150 = vmatpush2.bf16.msra.mxu0 %v2849_v1  ;;  %v2926_v1 = vld [vmem:[%s3945_s7 + $0x1d4] ss:$8 sps:$4 sm:$0xff]  }
 0x1d7   :  { %2151 = vmatprep.subr.bf16.mxu0 %v2857_v2  ;;  %v2924_v2 = vld [vmem:[%s3945_s7 + $0x1d0] ss:$8 sps:$4 sm:$0xff]  }
 0x1da   :  { %2152 = vmatpush2.bf16.msra.mxu0 %v2855_v4  ;;  %v2929_v4 = vld [vmem:[%s3945_s7 + $0x1c4] ss:$8 sps:$4 sm:$0xff]  }
 0x1db   :  { %2153 = vmatprep.subr.bf16.mxu0 %v2863_v5  ;;  %v2927_v5 = vld [vmem:[%s3945_s7 + $0x1c0] ss:$8 sps:$4 sm:$0xff]  }
 0x1de   :  { %2154 = vmatpush2.bf16.msra.mxu0 %v2861_v7  ;;  %v2932_v7 = vld [vmem:[%s3945_s7 + $0x1b4] ss:$8 sps:$4 sm:$0xff]  }
 0x1df   :  { %2155 = vmatprep.subr.bf16.mxu0 %v2869_v8  ;;  %v2930_v8 = vld [vmem:[%s3945_s7 + $0x1b0] ss:$8 sps:$4 sm:$0xff]  }
 0x1e2   :  { %2156 = vmatpush2.bf16.msra.mxu0 %v2867_v9  ;;  %v2935_v9 = vld [vmem:[%s3945_s7 + $0x1a4] ss:$8 sps:$4 sm:$0xff]  }
 0x1e3   :  { %v1178_v14 = vpop.f32.mrf.mxu0  ;;  %2157 = vmatprep.subr.bf16.mxu0 %v2875_v10  ;;  %v1221_v3 = vpop.f32.mrf.mxu1  ;;  %v2933_v10 = vld [vmem:[%s3945_s7 + $0x1a0] ss:$8 sps:$4 sm:$0xff]  }
 0x1e4   :  { %v1179_v16 = vadd.f32 %v1178_v14, %v409_v11  ;;  %v2939_v14 = vld [vmem:[%s3945_s7 + $0x180] ss:$8 sps:$4 sm:$0xff]  }
 0x1e5   :  { %v1180_v17 = vpop.f32.mrf.mxu0  ;;  %v1223_v28 = vpop.f32.mrf.mxu1 }
 0x1e6   :  { %v1181_v18 = vadd.f32 %v1180_v17, %v413_v12  ;;  %2158 = vmatpush2.bf16.msra.mxu0 %v2873_v13  ;;  %v1222_v22 = vadd.f32 %v1221_v3, %v1179_v16  ;;  %v2941_v13 = vld [vmem:[%s3945_s7 + $0x184] ss:$8 sps:$4 sm:$0xff]   ;;  %v1314_v3 = vld [vmem:[%s3944_s6] sm:$0x3] }
 0x1e7   :  { %v1182_v26 = vpop.f32.mrf.mxu0  ;;  %2159 = vmatprep.subr.bf16.mxu0 %v2881_v15  ;;  %v1225_v21 = vpop.f32.mrf.mxu1  ;;  %v1319_v17 = vrot.slane %v1314_v3, %v3304_v25 }
 0x1e8   :  { %v1224_v19 = vadd.f32 %v1223_v28, %v1181_v18  ;;  %v1183_v20 = vadd.f32 %v1182_v26, %v409_v11  ;;  %v1232_v37 = vmul.f32 0.2, %v1222_v22  ;;  %v2938_v11 = vld [vmem:[%s3945_s7 + $0x194] ss:$8 sps:$4 sm:$0xff]   ;;  %v1323_v18 = vrot.slane %v1314_v3, %v3301_v24 }
 0x1e9   :  { %v1184_v27 = vpop.f32.mrf.mxu0  ;;  %v1227_v32 = vpop.f32.mrf.mxu1 }
 0x1ea   :  { %v1226_v29 = vadd.f32 %v1225_v21, %v1183_v20  ;;  %v1185_v30 = vadd.f32 %v1184_v27, %v413_v12  ;;  %2160 = vmatpush2.bf16.msra.mxu0 %v2879_v23  ;;  %v1233_v34 = vmul.f32 0.2, %v1224_v19  ;;  %v1240_v43 = vmax.f32 %v1222_v22, %v1232_v37  ;;  %v2936_v12 = vld [vmem:[%s3945_s7 + $0x190] ss:$8 sps:$4 sm:$0xff]  }
 0x1eb   :  { %2161 = vmatprep.subr.bf16.mxu0 %v2887_v6 }
 0x1ec   :  { %v1236_v35 = vmul.f32 0.2, %v1226_v29  ;;  %v1228_v36 = vadd.f32 %v1227_v32, %v1185_v30  ;;  %v1241_v41 = vmax.f32 %v1224_v19, %v1233_v34 }
 0x1ee   :  { %v1237_v38 = vmul.f32 0.2, %v1228_v36  ;;  %2162 = vmatpush2.bf16.msra.mxu0 %v2885_v31  ;;  %v1244_v40 = vmax.f32 %v1226_v29, %v1236_v35  ;;  %v1801_v35 = vld [vmem:[%s3946_s8] sm:$0x3] }
 0x1ef   :  { %2163 = vmatprep.subr.bf16.mxu0 %v2893_v33  ;;  %v1806_v37 = vrot.slane %v1801_v35, %v3304_v25 }
 0x1f0   :  { %v1245_v42 = vmax.f32 %v1228_v36, %v1237_v38  ;;  %v3823_v46 = vpack.c.bf16 %v1244_v40, %v1240_v43  ;;  %v1810_v38 = vrot.slane %v1801_v35, %v3301_v24 }
 0x1f2   :  { %2164 = vmatpush2.bf16.msra.mxu0 %v2891_v39  ;;  %v1249_v44 = vpack.c.bf16 %v1245_v42, %v1241_v41 }
 0x1f4   :  { %1721 = vmatprep.mubr.bf16.mxu1 %v1249_v44 }
 0x1f5   :  { %1722 = vmatmul.mubr.bf16.vlgmr.msra.gmra.mxu1 %v3823_v46  ;;  %2166 = vmatmul.mubr.bf16.vlgmr.msra.gmra.mxu0 %v3721_v49  ;;  %v2905_v49 = vld [vmem:[%s3945_s7 + $0x144] ss:$8 sps:$4 sm:$0xff]  }
 0x1f6   :  { %2177 = vmatpush1.bf16.msra.mxu1 %v2894_v45  ;;  %2208 = vmatprep.mubr.bf16.mxu1 %v1249_v44 }
 0x1f7   :  { %2178 = vmatprep.subr.bf16.mxu1 %v2899_v47 }
 0x1fa   :  { %2179 = vmatpush1.bf16.msra.mxu1 %v2897_v48 }
 0x1fb   :  { %2180 = vmatprep.subr.bf16.mxu1 %v2902_v50 }
 0x1fe   :  { %2181 = vmatpush1.bf16.msra.mxu1 %v2900_v51 }
 0x1ff   :  { %2182 = vmatprep.subr.bf16.mxu1 %v2905_v49 }
 0x202   :  { %2183 = vmatpush1.bf16.msra.mxu1 %v2903_v52 }
 0x203   :  { %2184 = vmatprep.subr.bf16.mxu1 %v2908_v53 }
 0x206   :  { %2185 = vmatpush1.bf16.msra.mxu1 %v2906_v54 }
 0x207   :  { %2186 = vmatprep.subr.bf16.mxu1 %v2911_v55 }
 0x20a   :  { %2187 = vmatpush1.bf16.msra.mxu1 %v2909_v56 }
 0x20b   :  { %2188 = vmatprep.subr.bf16.mxu1 %v2914_v57 }
 0x20e   :  { %2189 = vmatpush1.bf16.msra.mxu1 %v2912_v58 }
 0x20f   :  { %2190 = vmatprep.subr.bf16.mxu1 %v2917_v59 }
 0x212   :  { %2191 = vmatpush1.bf16.msra.mxu1 %v2915_v60 }
 0x213   :  { %2192 = vmatprep.subr.bf16.mxu1 %v2920_v61 }
 0x216   :  { %2193 = vmatpush2.bf16.msra.mxu1 %v2918_v62 }
 0x217   :  { %2194 = vmatprep.subr.bf16.mxu1 %v2923_v63 }
 0x21a   :  { %2195 = vmatpush2.bf16.msra.mxu1 %v2921_v0 }
 0x21b   :  { %2196 = vmatprep.subr.bf16.mxu1 %v2926_v1 }
 0x21e   :  { %2197 = vmatpush2.bf16.msra.mxu1 %v2924_v2 }
 0x21f   :  { %2198 = vmatprep.subr.bf16.mxu1 %v2929_v4 }
 0x222   :  { %2199 = vmatpush2.bf16.msra.mxu1 %v2927_v5 }
 0x223   :  { %2200 = vmatprep.subr.bf16.mxu1 %v2932_v7 }
 0x226   :  { %2201 = vmatpush2.bf16.msra.mxu1 %v2930_v8 }
 0x227   :  { %2202 = vmatprep.subr.bf16.mxu1 %v2935_v9 }
 0x22a   :  { %2203 = vmatpush2.bf16.msra.mxu1 %v2933_v10 }
 0x22b   :  { %2204 = vmatprep.subr.bf16.mxu1 %v2938_v11 }
 0x22e   :  { %2205 = vmatpush2.bf16.msra.mxu1 %v2936_v12 }
 0x22f   :  { %2206 = vmatprep.subr.bf16.mxu1 %v2941_v13 }
 0x232   :  { %2207 = vmatpush2.bf16.msra.mxu1 %v2939_v14 }
 0x235   :  { %2209 = vmatmul.mubr.bf16.vlgmr.msra.gmra.mxu1 %v3823_v46 }
 0x275   :  { %v1680_v15 = vpop.f32.mrf.mxu0 }
 0x276   :  { %v1681_v23 = vadd.f32 %v1680_v15, %v1319_v17 }
 0x277   :  { %v1682_v16 = vpop.f32.mrf.mxu0 }
 0x278   :  { %v1683_v6 = vadd.f32 %v1682_v16, %v1323_v18 }
 0x279   :  { %v1684_v28 = vpop.f32.mrf.mxu0 }
 0x27a   :  { %v1685_v22 = vadd.f32 %v1684_v28, %v1319_v17 }
 0x27b   :  { %v1686_v20 = vpop.f32.mrf.mxu0 }
 0x27c   :  { %v1687_v30 = vadd.f32 %v1686_v20, %v1323_v18 }
 0x2b5   :  { %v1723_v26 = vpop.f32.mrf.mxu1  ;;  %v2167_v34 = vpop.f32.mrf.mxu0 }
 0x2b6   :  { %v1724_v19 = vadd.f32 %v1723_v26, %v1681_v23  ;;  %v2168_v40 = vadd.f32 %v2167_v34, %v1806_v37 }
 0x2b7   :  { %v1725_v21 = vpop.f32.mrf.mxu1  ;;  %v2169_v36 = vpop.f32.mrf.mxu0 }
 0x2b8   :  { %1732 = vst [vmem:[#allocation2] sm:$0xff] %v1724_v19  ;;  %v1726_v27 = vadd.f32 %v1725_v21, %v1683_v6  ;;  %v2170_v42 = vadd.f32 %v2169_v36, %v1810_v38 }
 0x2b9   :  { %v1727_v29 = vpop.f32.mrf.mxu1  ;;  %v2171_v39 = vpop.f32.mrf.mxu0 }
 0x2ba   :  { %1734 = vst.msk [vmem:[#allocation2 + $0x8] sm:$0xff] %vm1733_vm1, %v1726_v27  ;;  %v1728_v31 = vadd.f32 %v1727_v29, %v1685_v22  ;;  %v2172_v46 = vadd.f32 %v2171_v39, %v1806_v37 }
 0x2bb   :  { %v1729_v32 = vpop.f32.mrf.mxu1  ;;  %v2173_v44 = vpop.f32.mrf.mxu0 }
 0x2bc   :  { %1735 = vst [vmem:[#allocation2 + $0x10] sm:$0xff] %v1728_v31  ;;  %v1730_v33 = vadd.f32 %v1729_v32, %v1687_v30  ;;  %v2174_v50 = vadd.f32 %v2173_v44, %v1810_v38 }
 0x2be   :  { %1736 = vst.msk [vmem:[#allocation2 + $0x18] sm:$0xff] %vm1733_vm1, %v1730_v33 }
 0x2f5   :  { %v2210_v41 = vpop.f32.mrf.mxu1 }
 0x2f6   :  { %v2211_v43 = vadd.f32 %v2210_v41, %v2168_v40 }
 0x2f7   :  { %v2212_v45 = vpop.f32.mrf.mxu1 }
 0x2f8   :  { %2219 = vst [vmem:[#allocation4] sm:$0xff] %v2211_v43  ;;  %v2213_v47 = vadd.f32 %v2212_v45, %v2170_v42 }
 0x2f9   :  { %v2214_v48 = vpop.f32.mrf.mxu1 }
 0x2fa   :  { %2220 = vst.msk [vmem:[#allocation4 + $0x8] sm:$0xff] %vm1733_vm1, %v2213_v47  ;;  %v2215_v51 = vadd.f32 %v2214_v48, %v2172_v46 }
 0x2fb   :  { %v2216_v49 = vpop.f32.mrf.mxu1 }
 0x2fc   :  { %2221 = vst [vmem:[#allocation4 + $0x10] sm:$0xff] %v2215_v51  ;;  %v2217_v25 = vadd.f32 %v2216_v49, %v2174_v50 }
 0x2fe   :  { %2222 = vst.msk [vmem:[#allocation4 + $0x18] sm:$0xff] %vm1733_vm1, %v2217_v25 }
 0x2ff   :  { %2227 = vsyncadd [#allocation3], 256  ;;  %s2987_s8 = smov [#allocation2]  }
 0x300   :  { %s2228_s26 = sshll.u32 %s2987_s8, 4  ;;  %s2229_s26 = int_to_ptr.vmem [resolvable:$true] %s2228_s26 }
 0x301   :  { %s2942_s27 = scalar_lea.vmem %s2229_s26, 256  ;;  %s2946_s28 = scalar_lea.vmem %s2229_s26, 512 }
 0x302   :  { %p2943_p0 = scmp.ne.s32.totalorder %s2229_s26, %s2942_s27  ;;  %p2947_p1 = scmp.lt.s32.totalorder %s2229_s26, %s2229_s26 }
 0x303   :  { %p2948_p2 = scmp.lt.s32.totalorder %s2946_s28, %s2942_s27 }
 0x305   :  { %p2949_p3 = por %p2948_p2, %p2947_p1 }
 0x307   :  { %p2950_p4 = pnand %p2949_p3, %p2943_p0 }
 0x309   :  { %2953 = shalt.err (!%p2950_p4)
}
 0x30a   :  { %s2988_s29 = smov 256   ;;  %s2989_s4 = smov 16  }
 0x30b   :  { %2234 = dma.vmem_to_hbm [thread:$0]  %s2229_s26, 256, %s3947_s9, [#allocation3], %s2988_s29, %s2988_s29, %s2989_s4  }
 0x30c   :  { %2239 = vsyncadd [#allocation5], 256  ;;  %s2990_s2 = smov [#allocation4]  }
 0x30d   :  { %s2240_s11 = sshll.u32 %s2990_s2, 4  ;;  %s2241_s11 = int_to_ptr.vmem [resolvable:$true] %s2240_s11 }
 0x30e   :  { %s2962_s12 = scalar_lea.vmem %s2241_s11, 256  ;;  %s2966_s1 = scalar_lea.vmem %s2241_s11, 512 }
 0x30f   :  { %p2963_p5 = scmp.ne.s32.totalorder %s2241_s11, %s2962_s12  ;;  %p2967_p6 = scmp.lt.s32.totalorder %s2241_s11, %s2241_s11 }
 0x310   :  { %p2968_p7 = scmp.lt.s32.totalorder %s2966_s1, %s2962_s12 }
 0x312   :  { %p2969_p8 = por %p2968_p7, %p2967_p6 }
 0x314   :  { %p2970_p9 = pnand %p2969_p8, %p2963_p5 }
 0x316   :  { %2973 = shalt.err (!%p2970_p9)
}
 0x317   :  { %2246 = dma.vmem_to_hbm [thread:$0]  %s2241_s11, 256, %s3948_s10, [#allocation5], %s2988_s29, %s2988_s29, %s2989_s4  }
 0x318   :  { %2982 = dma.done.wait [#allocation3], 512  }
 0x319   :  { %2983 = vsyncadd [#allocation3], 4294966784 }
 0x31a   :  { %2984 = dma.done.wait [#allocation5], 512  }
 0x31b   :  { %2985 = vsyncadd [#allocation5], 4294966784 }
 0x31c   :  { %2253 = vsyncpa [#allocation3], 1 }
 0x31d   :  { %2254 = vsyncpa [#allocation5], 1 }

</bundles_post_ra>
